<compile_context>
chip_gen: v6e
topology: v6e:2x2x1
jax: 0.10.0
libtpu: 0.0.40
codegen_flags: <defaults>
</compile_context>

<pallas_src>
from functools import partial

import jax
import jax.numpy as jnp
from jax.experimental import pallas as pl
from jax.experimental.pallas import tpu as pltpu


# ----------------------------------------------------------------------------
# Fused forward kernel
# ----------------------------------------------------------------------------
def _seqnet_kernel(x_ref, mean_ref, w1_ref, b1_ref, m1_ref,
                   w2_ref, b2_ref, m2_ref,
                   wfc1_ref, bfc1_ref, wfc2_ref, bfc2_ref,
                   o_ref, *, n_img, img_h, img_w, c2_out, k1, k2):
    f32 = jnp.float32
    hw = img_h * img_w                       # 256 lanes per image-channel row

    # Rolled + masked taps, stacked along sublanes for ONE fused MXU matmul.
    def tap_stack(z, ksize, masks):
        taps = []
        t = 0
        for i in range(ksize):
            for j in range(ksize):
                dy, dx = i - 1, j - 1        # padding = 1 for both convs
                d = dy * img_w + dx
                s = pltpu.roll(z, (-d) % hw, axis=1) if d != 0 else z
                taps.append(s * masks[t:t + 1, :])     # zero-pad via mask
                t += 1
        return jnp.concatenate(taps, axis=0)

    # ---- normalization: subtract mean (1/std already folded into w1) -------
    xm = x_ref[...] - mean_ref[...]                     # (N*4, 256)

    # ---- conv1 (3x3, s1, p1) + ReLU -----------------------------------------
    t1 = tap_stack(xm, k1, m1_ref[...])                 # (72, 256)
    z1 = jnp.maximum(
        jnp.dot(w1_ref[...], t1, preferred_element_type=f32) + b1_ref[...],
        0.0)                                            # (N*8, 256)

    # ---- conv2 (4x4, p1) at STRIDE 1 + bias + ReLU --------------------------
    # (stride-2 selection commutes with bias/ReLU and is folded into wfc1_big)
    t2 = tap_stack(z1, k2, m2_ref[...])                 # (256, 256)
    z2 = jnp.maximum(
        jnp.dot(w2_ref[...], t2, preferred_element_type=f32) + b2_ref[...],
        0.0)                                            # (N*16, 256)

    # ---- flatten: xf[n, c*hw + l] = z2[n*16 + c, l] --------------------------
    # Only aligned row slices + 256-lane-aligned concats (no masked stores,
    # no scratch).  Stride-2 select + PyTorch (c,oy,ox) flatten order live in
    # the zero-expanded fc1 weight.
    pieces = []
    for c in range(c2_out):
        rows = [z2[n * c2_out + c:n * c2_out + c + 1, :] for n in range(n_img)]
        pieces.append(rows[0] if n_img == 1 else jnp.concatenate(rows, axis=0))
    xf = jnp.concatenate(pieces, axis=1)                # (N, 16*256) = (N, 4096)

    # ---- fc1 + ReLU + fc2 (intermediates never leave vregs/VMEM) ------------
    h = jax.lax.dot_general(xf, wfc1_ref[...], (((1,), (1,)), ((), ())),
                            preferred_element_type=f32) + bfc1_ref[...]
    h = jnp.maximum(h, 0.0)                             # (N, 32)
    out = jnp.dot(h, wfc2_ref[...], preferred_element_type=f32) + bfc2_ref[...]
    o_ref[...] = out.astype(o_ref.dtype)                # (N, 10)


# ----------------------------------------------------------------------------
# One-time parameter preprocessing (all layout work hoisted out of forward)
# ----------------------------------------------------------------------------
def prepare_params(params, input_shape):
    """Fold 1/std into conv1, build block-diagonal tap-stacked conv weights,
    boundary masks, and the zero-expanded stride-2+flatten fc1 weight.
    Conv weights are block-diagonal over the N images (rebuild if N changes)."""
    N, C, H, W = input_shape
    f32 = jnp.float32
    hw = H * W
    oh, ow = H // 2, W // 2
    eye_n = jnp.eye(N, dtype=f32)

    inv_std = (1.0 / params["std"]).astype(f32)
    w1 = params["conv1_w"].astype(f32) * inv_std[None, :, None, None]  # exact fold
    co1, ci1, kh1, kw1 = w1.shape
    w2 = params["conv2_w"].astype(f32)
    co2, ci2, kh2, kw2 = w2.shape

    # rows (n, co); cols (tap, n, ci)  -- block-diagonal over images
    w1_t = jnp.transpose(w1, (2, 3, 0, 1)).reshape(kh1 * kw1, co1, ci1)
    w1_bd = jnp.einsum("toc,nm->notmc", w1_t, eye_n).reshape(
        N * co1, kh1 * kw1 * N * ci1)                                  # (16, 72)
    w2_t = jnp.transpose(w2, (2, 3, 0, 1)).reshape(kh2 * kw2, co2, ci2)
    w2_bd = jnp.einsum("toc,nm->notmc", w2_t, eye_n).reshape(
        N * co2, kh2 * kw2 * N * ci2)                                  # (32, 256)

    def boundary_masks(ksize):
        l = jnp.arange(hw)
        y, x = l // W, l % W
        rows = []
        for i in range(ksize):
            for j in range(ksize):
                dy, dx = i - 1, j - 1
                ok = (y + dy >= 0) & (y + dy < H) & (x + dx >= 0) & (x + dx < W)
                rows.append(ok.astype(f32))
        return jnp.stack(rows)                                         # (k*k, hw)

    # fc1 weight: zero-expand to stride-1 positions (folds the stride-2
    # selection) and reorder columns to (c, y, x) over the full H x W grid.
    nk = params["fc1_w"].shape[0]
    wf = params["fc1_w"].astype(f32).reshape(nk, co2, oh, ow)
    wfc1_big = jnp.zeros((nk, co2, H, W), f32).at[:, :, ::2, ::2].set(wf)
    wfc1_big = wfc1_big.reshape(nk, co2 * hw)                          # (32, 4096)

    return {
        "mean": jnp.tile(params["mean"].astype(f32), N).reshape(N * C, 1),
        "w1": w1_bd,
        "b1": jnp.tile(params["conv1_b"].astype(f32), N).reshape(N * co1, 1),
        "masks1": boundary_masks(kh1),                                 # (9, 256)
        "w2": w2_bd,
        "b2": jnp.tile(params["conv2_b"].astype(f32), N).reshape(N * co2, 1),
        "masks2": boundary_masks(kh2),                                 # (16, 256)
        "wfc1": wfc1_big,
        "bfc1": params["fc1_b"].astype(f32).reshape(1, -1),
        "wfc2": params["fc2_w"].astype(f32).T,                         # (32, 10)
        "bfc2": params["fc2_b"].astype(f32).reshape(1, -1),
    }


# ----------------------------------------------------------------------------
# Forward pass: one fused pallas_call
# ----------------------------------------------------------------------------
@jax.jit
def seqnet_forward(x, prepped):
    # is_double=False, skip_norm=False, init_lambda is a no-op here.
    N, C, H, W = x.shape
    x2 = x.reshape(N * C, H * W).astype(jnp.float32)   # free NCHW reshape
    num_out = prepped["wfc2"].shape[1]
    c2_out = prepped["b2"].shape[0] // N
    k1 = int(prepped["masks1"].shape[0] ** 0.5 + 0.5)
    k2 = int(prepped["masks2"].shape[0] ** 0.5 + 0.5)

    operands = (x2, prepped["mean"], prepped["w1"], prepped["b1"],
                prepped["masks1"], prepped["w2"], prepped["b2"],
                prepped["masks2"], prepped["wfc1"], prepped["bfc1"],
                prepped["wfc2"], prepped["bfc2"])

    def full(shape):
        nd = len(shape)
        return pl.BlockSpec(shape, lambda i, _nd=nd: (0,) * _nd)

    flops = 2 * (prepped["w1"].shape[0] * prepped["w1"].shape[1] * H * W
                 + prepped["w2"].shape[0] * prepped["w2"].shape[1] * H * W
                 + N * prepped["wfc1"].shape[1] * prepped["wfc1"].shape[0]
                 + N * prepped["wfc2"].shape[0] * num_out)
    bytes_accessed = 4 * (sum(int(a.size) for a in operands) + N * num_out)

    kernel = partial(_seqnet_kernel, n_img=N, img_h=H, img_w=W,
                     c2_out=c2_out, k1=k1, k2=k2)
    return pl.pallas_call(
        kernel,
        out_shape=jax.ShapeDtypeStruct((N, num_out), jnp.float32),
        grid=(1,),
        in_specs=[full(a.shape) for a in operands],
        out_specs=full((N, num_out)),
        compiler_params=pltpu.CompilerParams(
            dimension_semantics=("arbitrary",)),
        cost_estimate=pl.CostEstimate(flops=flops, transcendentals=0,
                                      bytes_accessed=bytes_accessed),
    )(*operands)


# ----------------------------------------------------------------------------
# Parameters + pure-JAX reference (sanity check only)
# ----------------------------------------------------------------------------
def init_params(key):
    ks = jax.random.split(key, 8)
    f32 = jnp.float32
    return {
        "mean": jnp.array([0.1, 0.2, 0.3, 0.4], f32),
        "std": jnp.array([0.9, 1.0, 1.1, 1.2], f32),
        "conv1_w": 0.1 * jax.random.normal(ks[0], (8, 4, 3, 3), f32),
        "conv1_b": 0.1 * jax.random.normal(ks[1], (8,), f32),
        "conv2_w": 0.1 * jax.random.normal(ks[2], (16, 8, 4, 4), f32),
        "conv2_b": 0.1 * jax.random.normal(ks[3], (16,), f32),
        "fc1_w": 0.05 * jax.random.normal(ks[4], (32, 16 * 8 * 8), f32),
        "fc1_b": 0.05 * jax.random.normal(ks[5], (32,), f32),
        "fc2_w": 0.05 * jax.random.normal(ks[6], (10, 32), f32),
        "fc2_b": 0.05 * jax.random.normal(ks[7], (10,), f32),
    }


def seqnet_reference(x, params):
    m = params["mean"].reshape(1, -1, 1, 1)
    s = params["std"].reshape(1, -1, 1, 1)
    x = (x - m) / s
    dn = ("NCHW", "OIHW", "NCHW")
    x = jax.lax.conv_general_dilated(x, params["conv1_w"], (1, 1),
                                     [(1, 1), (1, 1)], dimension_numbers=dn)
    x = jnp.maximum(x + params["conv1_b"].reshape(1, -1, 1, 1), 0.0)
    x = jax.lax.conv_general_dilated(x, params["conv2_w"], (2, 2),
                                     [(1, 1), (1, 1)], dimension_numbers=dn)
    x = jnp.maximum(x + params["conv2_b"].reshape(1, -1, 1, 1), 0.0)
    x = x.reshape(x.shape[0], -1)
    x = jnp.maximum(x @ params["fc1_w"].T + params["fc1_b"], 0.0)
    x = x @ params["fc2_w"].T + params["fc2_b"]
    return x


if __name__ == "__main__":
    key = jax.random.PRNGKey(0)
    k_x, k_p = jax.random.split(key)
    x = jax.random.normal(k_x, (2, 4, 16, 16), jnp.float32)   # NCHW, like PyTorch
    params = init_params(k_p)
    prepped = prepare_params(params, x.shape)                 # one-time prep

    out = jax.block_until_ready(seqnet_forward(x, prepped))
    assert out.shape == (2, 10) and out.dtype == jnp.float32

    ref = jax.block_until_ready(seqnet_reference(x, params))
    assert jnp.allclose(out, ref, rtol=1e-3, atol=1e-3), "mismatch vs JAX reference"

    print("KERNEL_OK")
</pallas_src>

<mosaic_0001>
module attributes {stable_mosaic.version = 11 : i64} {
  func.func @_seqnet_kernel(%arg0: i32, %arg1: memref<8x256xf32, #tpu.memory_space<vmem>>, %arg2: memref<8x1xf32, #tpu.memory_space<vmem>>, %arg3: memref<16x72xf32, #tpu.memory_space<vmem>>, %arg4: memref<16x1xf32, #tpu.memory_space<vmem>>, %arg5: memref<9x256xf32, #tpu.memory_space<vmem>>, %arg6: memref<32x256xf32, #tpu.memory_space<vmem>>, %arg7: memref<32x1xf32, #tpu.memory_space<vmem>>, %arg8: memref<16x256xf32, #tpu.memory_space<vmem>>, %arg9: memref<32x4096xf32, #tpu.memory_space<vmem>>, %arg10: memref<1x32xf32, #tpu.memory_space<vmem>>, %arg11: memref<32x10xf32, #tpu.memory_space<vmem>>, %arg12: memref<1x10xf32, #tpu.memory_space<vmem>>, %arg13: memref<2x10xf32, #tpu.memory_space<vmem>>) attributes {dimension_semantics = [#tpu.dimension_semantics<arbitrary>], iteration_bounds = array<i64: 1>, scalar_prefetch = 0 : i64, scratch_operands = 0 : i64, tpu.core_type = #tpu.core_type<tc>, window_params = [{pipeline_mode = #tpu.pipeline_mode<synchronous>, transform_indices = @transform_0, window_bounds = array<i64: 8, 256>}, {pipeline_mode = #tpu.pipeline_mode<synchronous>, transform_indices = @transform_1, window_bounds = array<i64: 8, 1>}, {pipeline_mode = #tpu.pipeline_mode<synchronous>, transform_indices = @transform_2, window_bounds = array<i64: 16, 72>}, {pipeline_mode = #tpu.pipeline_mode<synchronous>, transform_indices = @transform_3, window_bounds = array<i64: 16, 1>}, {pipeline_mode = #tpu.pipeline_mode<synchronous>, transform_indices = @transform_4, window_bounds = array<i64: 9, 256>}, {pipeline_mode = #tpu.pipeline_mode<synchronous>, transform_indices = @transform_5, window_bounds = array<i64: 32, 256>}, {pipeline_mode = #tpu.pipeline_mode<synchronous>, transform_indices = @transform_6, window_bounds = array<i64: 32, 1>}, {pipeline_mode = #tpu.pipeline_mode<synchronous>, transform_indices = @transform_7, window_bounds = array<i64: 16, 256>}, {pipeline_mode = #tpu.pipeline_mode<synchronous>, transform_indices = @transform_8, window_bounds = array<i64: 32, 4096>}, {pipeline_mode = #tpu.pipeline_mode<synchronous>, transform_indices = @transform_9, window_bounds = array<i64: 1, 32>}, {pipeline_mode = #tpu.pipeline_mode<synchronous>, transform_indices = @transform_10, window_bounds = array<i64: 32, 10>}, {pipeline_mode = #tpu.pipeline_mode<synchronous>, transform_indices = @transform_11, window_bounds = array<i64: 1, 10>}, {pipeline_mode = #tpu.pipeline_mode<synchronous>, transform_indices = @transform_12, window_bounds = array<i64: 2, 10>}]} {
    %c0 = arith.constant 0 : index
    %c0_0 = arith.constant 0 : index
    %0 = vector.load %arg1[%c0, %c0_0] : memref<8x256xf32, #tpu.memory_space<vmem>>, vector<8x256xf32>
    %c0_1 = arith.constant 0 : index
    %c0_2 = arith.constant 0 : index
    %1 = vector.load %arg2[%c0_1, %c0_2] : memref<8x1xf32, #tpu.memory_space<vmem>>, vector<8x1xf32>
    %2 = vector.broadcast %1 : vector<8x1xf32> to vector<8x256xf32>
    %3 = arith.subf %0, %2 : vector<8x256xf32>
    %c0_3 = arith.constant 0 : index
    %c0_4 = arith.constant 0 : index
    %4 = vector.load %arg5[%c0_3, %c0_4] : memref<9x256xf32, #tpu.memory_space<vmem>>, vector<9x256xf32>
    %c17_i32 = arith.constant 17 : i32
    %5 = tpu.dynamic_rotate %3 by %c17_i32 dim 1 : vector<8x256xf32>, i32 -> vector<8x256xf32>
    %6 = vector.extract_strided_slice %4 {offsets = [0, 0], sizes = [1, 256], strides = [1, 1]} : vector<9x256xf32> to vector<1x256xf32>
    %7 = vector.broadcast %6 : vector<1x256xf32> to vector<8x256xf32>
    %8 = arith.mulf %5, %7 : vector<8x256xf32>
    %c16_i32 = arith.constant 16 : i32
    %9 = tpu.dynamic_rotate %3 by %c16_i32 dim 1 : vector<8x256xf32>, i32 -> vector<8x256xf32>
    %10 = vector.extract_strided_slice %4 {offsets = [1, 0], sizes = [1, 256], strides = [1, 1]} : vector<9x256xf32> to vector<1x256xf32>
    %11 = vector.broadcast %10 : vector<1x256xf32> to vector<8x256xf32>
    %12 = arith.mulf %9, %11 : vector<8x256xf32>
    %c15_i32 = arith.constant 15 : i32
    %13 = tpu.dynamic_rotate %3 by %c15_i32 dim 1 : vector<8x256xf32>, i32 -> vector<8x256xf32>
    %14 = vector.extract_strided_slice %4 {offsets = [2, 0], sizes = [1, 256], strides = [1, 1]} : vector<9x256xf32> to vector<1x256xf32>
    %15 = vector.broadcast %14 : vector<1x256xf32> to vector<8x256xf32>
    %16 = arith.mulf %13, %15 : vector<8x256xf32>
    %c1_i32 = arith.constant 1 : i32
    %17 = tpu.dynamic_rotate %3 by %c1_i32 dim 1 : vector<8x256xf32>, i32 -> vector<8x256xf32>
    %18 = vector.extract_strided_slice %4 {offsets = [3, 0], sizes = [1, 256], strides = [1, 1]} : vector<9x256xf32> to vector<1x256xf32>
    %19 = vector.broadcast %18 : vector<1x256xf32> to vector<8x256xf32>
    %20 = arith.mulf %17, %19 : vector<8x256xf32>
    %21 = vector.extract_strided_slice %4 {offsets = [4, 0], sizes = [1, 256], strides = [1, 1]} : vector<9x256xf32> to vector<1x256xf32>
    %22 = vector.broadcast %21 : vector<1x256xf32> to vector<8x256xf32>
    %23 = arith.mulf %3, %22 : vector<8x256xf32>
    %c255_i32 = arith.constant 255 : i32
    %24 = tpu.dynamic_rotate %3 by %c255_i32 dim 1 : vector<8x256xf32>, i32 -> vector<8x256xf32>
    %25 = vector.extract_strided_slice %4 {offsets = [5, 0], sizes = [1, 256], strides = [1, 1]} : vector<9x256xf32> to vector<1x256xf32>
    %26 = vector.broadcast %25 : vector<1x256xf32> to vector<8x256xf32>
    %27 = arith.mulf %24, %26 : vector<8x256xf32>
    %c241_i32 = arith.constant 241 : i32
    %28 = tpu.dynamic_rotate %3 by %c241_i32 dim 1 : vector<8x256xf32>, i32 -> vector<8x256xf32>
    %29 = vector.extract_strided_slice %4 {offsets = [6, 0], sizes = [1, 256], strides = [1, 1]} : vector<9x256xf32> to vector<1x256xf32>
    %30 = vector.broadcast %29 : vector<1x256xf32> to vector<8x256xf32>
    %31 = arith.mulf %28, %30 : vector<8x256xf32>
    %c240_i32 = arith.constant 240 : i32
    %32 = tpu.dynamic_rotate %3 by %c240_i32 dim 1 : vector<8x256xf32>, i32 -> vector<8x256xf32>
    %33 = vector.extract_strided_slice %4 {offsets = [7, 0], sizes = [1, 256], strides = [1, 1]} : vector<9x256xf32> to vector<1x256xf32>
    %34 = vector.broadcast %33 : vector<1x256xf32> to vector<8x256xf32>
    %35 = arith.mulf %32, %34 : vector<8x256xf32>
    %c239_i32 = arith.constant 239 : i32
    %36 = tpu.dynamic_rotate %3 by %c239_i32 dim 1 : vector<8x256xf32>, i32 -> vector<8x256xf32>
    %37 = vector.extract_strided_slice %4 {offsets = [8, 0], sizes = [1, 256], strides = [1, 1]} : vector<9x256xf32> to vector<1x256xf32>
    %38 = vector.broadcast %37 : vector<1x256xf32> to vector<8x256xf32>
    %39 = arith.mulf %36, %38 : vector<8x256xf32>
    %40 = tpu.concatenate %8, %12, %16, %20, %23, %27, %31, %35, %39 in 0 : vector<8x256xf32>, vector<8x256xf32>, vector<8x256xf32>, vector<8x256xf32>, vector<8x256xf32>, vector<8x256xf32>, vector<8x256xf32>, vector<8x256xf32>, vector<8x256xf32> -> vector<72x256xf32>
    %c0_5 = arith.constant 0 : index
    %c0_6 = arith.constant 0 : index
    %41 = vector.load %arg3[%c0_5, %c0_6] : memref<16x72xf32, #tpu.memory_space<vmem>>, vector<16x72xf32>
    %cst = arith.constant dense<0.000000e+00> : vector<16x256xf32>
    %42 = tpu.matmul %41, %40, %cst {dimension_numbers = #tpu.dot_dimension_numbers<[1], [0], [0], [1], [0, 0, 1, 1], [], []>} : vector<16x72xf32>, vector<72x256xf32>, vector<16x256xf32> -> vector<16x256xf32>
    %c0_7 = arith.constant 0 : index
    %c0_8 = arith.constant 0 : index
    %43 = vector.load %arg4[%c0_7, %c0_8] : memref<16x1xf32, #tpu.memory_space<vmem>>, vector<16x1xf32>
    %44 = vector.broadcast %43 : vector<16x1xf32> to vector<16x256xf32>
    %45 = arith.addf %42, %44 : vector<16x256xf32>
    %cst_9 = arith.constant 0.000000e+00 : f32
    %46 = vector.broadcast %cst_9 : f32 to vector<16x256xf32>
    %47 = arith.maximumf %45, %46 : vector<16x256xf32>
    %c0_10 = arith.constant 0 : index
    %c0_11 = arith.constant 0 : index
    %48 = vector.load %arg8[%c0_10, %c0_11] : memref<16x256xf32, #tpu.memory_space<vmem>>, vector<16x256xf32>
    %c17_i32_12 = arith.constant 17 : i32
    %49 = tpu.dynamic_rotate %47 by %c17_i32_12 dim 1 : vector<16x256xf32>, i32 -> vector<16x256xf32>
    %50 = vector.extract_strided_slice %48 {offsets = [0, 0], sizes = [1, 256], strides = [1, 1]} : vector<16x256xf32> to vector<1x256xf32>
    %51 = vector.broadcast %50 : vector<1x256xf32> to vector<16x256xf32>
    %52 = arith.mulf %49, %51 : vector<16x256xf32>
    %c16_i32_13 = arith.constant 16 : i32
    %53 = tpu.dynamic_rotate %47 by %c16_i32_13 dim 1 : vector<16x256xf32>, i32 -> vector<16x256xf32>
    %54 = vector.extract_strided_slice %48 {offsets = [1, 0], sizes = [1, 256], strides = [1, 1]} : vector<16x256xf32> to vector<1x256xf32>
    %55 = vector.broadcast %54 : vector<1x256xf32> to vector<16x256xf32>
    %56 = arith.mulf %53, %55 : vector<16x256xf32>
    %c15_i32_14 = arith.constant 15 : i32
    %57 = tpu.dynamic_rotate %47 by %c15_i32_14 dim 1 : vector<16x256xf32>, i32 -> vector<16x256xf32>
    %58 = vector.extract_strided_slice %48 {offsets = [2, 0], sizes = [1, 256], strides = [1, 1]} : vector<16x256xf32> to vector<1x256xf32>
    %59 = vector.broadcast %58 : vector<1x256xf32> to vector<16x256xf32>
    %60 = arith.mulf %57, %59 : vector<16x256xf32>
    %c14_i32 = arith.constant 14 : i32
    %61 = tpu.dynamic_rotate %47 by %c14_i32 dim 1 : vector<16x256xf32>, i32 -> vector<16x256xf32>
    %62 = vector.extract_strided_slice %48 {offsets = [3, 0], sizes = [1, 256], strides = [1, 1]} : vector<16x256xf32> to vector<1x256xf32>
    %63 = vector.broadcast %62 : vector<1x256xf32> to vector<16x256xf32>
    %64 = arith.mulf %61, %63 : vector<16x256xf32>
    %c1_i32_15 = arith.constant 1 : i32
    %65 = tpu.dynamic_rotate %47 by %c1_i32_15 dim 1 : vector<16x256xf32>, i32 -> vector<16x256xf32>
    %66 = vector.extract_strided_slice %48 {offsets = [4, 0], sizes = [1, 256], strides = [1, 1]} : vector<16x256xf32> to vector<1x256xf32>
    %67 = vector.broadcast %66 : vector<1x256xf32> to vector<16x256xf32>
    %68 = arith.mulf %65, %67 : vector<16x256xf32>
    %69 = vector.extract_strided_slice %48 {offsets = [5, 0], sizes = [1, 256], strides = [1, 1]} : vector<16x256xf32> to vector<1x256xf32>
    %70 = vector.broadcast %69 : vector<1x256xf32> to vector<16x256xf32>
    %71 = arith.mulf %47, %70 : vector<16x256xf32>
    %c255_i32_16 = arith.constant 255 : i32
    %72 = tpu.dynamic_rotate %47 by %c255_i32_16 dim 1 : vector<16x256xf32>, i32 -> vector<16x256xf32>
    %73 = vector.extract_strided_slice %48 {offsets = [6, 0], sizes = [1, 256], strides = [1, 1]} : vector<16x256xf32> to vector<1x256xf32>
    %74 = vector.broadcast %73 : vector<1x256xf32> to vector<16x256xf32>
    %75 = arith.mulf %72, %74 : vector<16x256xf32>
    %c254_i32 = arith.constant 254 : i32
    %76 = tpu.dynamic_rotate %47 by %c254_i32 dim 1 : vector<16x256xf32>, i32 -> vector<16x256xf32>
    %77 = vector.extract_strided_slice %48 {offsets = [7, 0], sizes = [1, 256], strides = [1, 1]} : vector<16x256xf32> to vector<1x256xf32>
    %78 = vector.broadcast %77 : vector<1x256xf32> to vector<16x256xf32>
    %79 = arith.mulf %76, %78 : vector<16x256xf32>
    %c241_i32_17 = arith.constant 241 : i32
    %80 = tpu.dynamic_rotate %47 by %c241_i32_17 dim 1 : vector<16x256xf32>, i32 -> vector<16x256xf32>
    %81 = vector.extract_strided_slice %48 {offsets = [8, 0], sizes = [1, 256], strides = [1, 1]} : vector<16x256xf32> to vector<1x256xf32>
    %82 = vector.broadcast %81 : vector<1x256xf32> to vector<16x256xf32>
    %83 = arith.mulf %80, %82 : vector<16x256xf32>
    %c240_i32_18 = arith.constant 240 : i32
    %84 = tpu.dynamic_rotate %47 by %c240_i32_18 dim 1 : vector<16x256xf32>, i32 -> vector<16x256xf32>
    %85 = vector.extract_strided_slice %48 {offsets = [9, 0], sizes = [1, 256], strides = [1, 1]} : vector<16x256xf32> to vector<1x256xf32>
    %86 = vector.broadcast %85 : vector<1x256xf32> to vector<16x256xf32>
    %87 = arith.mulf %84, %86 : vector<16x256xf32>
    %c239_i32_19 = arith.constant 239 : i32
    %88 = tpu.dynamic_rotate %47 by %c239_i32_19 dim 1 : vector<16x256xf32>, i32 -> vector<16x256xf32>
    %89 = vector.extract_strided_slice %48 {offsets = [10, 0], sizes = [1, 256], strides = [1, 1]} : vector<16x256xf32> to vector<1x256xf32>
    %90 = vector.broadcast %89 : vector<1x256xf32> to vector<16x256xf32>
    %91 = arith.mulf %88, %90 : vector<16x256xf32>
    %c238_i32 = arith.constant 238 : i32
    %92 = tpu.dynamic_rotate %47 by %c238_i32 dim 1 : vector<16x256xf32>, i32 -> vector<16x256xf32>
    %93 = vector.extract_strided_slice %48 {offsets = [11, 0], sizes = [1, 256], strides = [1, 1]} : vector<16x256xf32> to vector<1x256xf32>
    %94 = vector.broadcast %93 : vector<1x256xf32> to vector<16x256xf32>
    %95 = arith.mulf %92, %94 : vector<16x256xf32>
    %c225_i32 = arith.constant 225 : i32
    %96 = tpu.dynamic_rotate %47 by %c225_i32 dim 1 : vector<16x256xf32>, i32 -> vector<16x256xf32>
    %97 = vector.extract_strided_slice %48 {offsets = [12, 0], sizes = [1, 256], strides = [1, 1]} : vector<16x256xf32> to vector<1x256xf32>
    %98 = vector.broadcast %97 : vector<1x256xf32> to vector<16x256xf32>
    %99 = arith.mulf %96, %98 : vector<16x256xf32>
    %c224_i32 = arith.constant 224 : i32
    %100 = tpu.dynamic_rotate %47 by %c224_i32 dim 1 : vector<16x256xf32>, i32 -> vector<16x256xf32>
    %101 = vector.extract_strided_slice %48 {offsets = [13, 0], sizes = [1, 256], strides = [1, 1]} : vector<16x256xf32> to vector<1x256xf32>
    %102 = vector.broadcast %101 : vector<1x256xf32> to vector<16x256xf32>
    %103 = arith.mulf %100, %102 : vector<16x256xf32>
    %c223_i32 = arith.constant 223 : i32
    %104 = tpu.dynamic_rotate %47 by %c223_i32 dim 1 : vector<16x256xf32>, i32 -> vector<16x256xf32>
    %105 = vector.extract_strided_slice %48 {offsets = [14, 0], sizes = [1, 256], strides = [1, 1]} : vector<16x256xf32> to vector<1x256xf32>
    %106 = vector.broadcast %105 : vector<1x256xf32> to vector<16x256xf32>
    %107 = arith.mulf %104, %106 : vector<16x256xf32>
    %c222_i32 = arith.constant 222 : i32
    %108 = tpu.dynamic_rotate %47 by %c222_i32 dim 1 : vector<16x256xf32>, i32 -> vector<16x256xf32>
    %109 = vector.extract_strided_slice %48 {offsets = [15, 0], sizes = [1, 256], strides = [1, 1]} : vector<16x256xf32> to vector<1x256xf32>
    %110 = vector.broadcast %109 : vector<1x256xf32> to vector<16x256xf32>
    %111 = arith.mulf %108, %110 : vector<16x256xf32>
    %112 = tpu.concatenate %52, %56, %60, %64, %68, %71, %75, %79, %83, %87, %91, %95, %99, %103, %107, %111 in 0 : vector<16x256xf32>, vector<16x256xf32>, vector<16x256xf32>, vector<16x256xf32>, vector<16x256xf32>, vector<16x256xf32>, vector<16x256xf32>, vector<16x256xf32>, vector<16x256xf32>, vector<16x256xf32>, vector<16x256xf32>, vector<16x256xf32>, vector<16x256xf32>, vector<16x256xf32>, vector<16x256xf32>, vector<16x256xf32> -> vector<256x256xf32>
    %c0_20 = arith.constant 0 : index
    %c0_21 = arith.constant 0 : index
    %113 = vector.load %arg6[%c0_20, %c0_21] : memref<32x256xf32, #tpu.memory_space<vmem>>, vector<32x256xf32>
    %cst_22 = arith.constant dense<0.000000e+00> : vector<32x256xf32>
    %114 = tpu.matmul %113, %112, %cst_22 {dimension_numbers = #tpu.dot_dimension_numbers<[1], [0], [0], [1], [0, 0, 1, 1], [], []>} : vector<32x256xf32>, vector<256x256xf32>, vector<32x256xf32> -> vector<32x256xf32>
    %c0_23 = arith.constant 0 : index
    %c0_24 = arith.constant 0 : index
    %115 = vector.load %arg7[%c0_23, %c0_24] : memref<32x1xf32, #tpu.memory_space<vmem>>, vector<32x1xf32>
    %116 = vector.broadcast %115 : vector<32x1xf32> to vector<32x256xf32>
    %117 = arith.addf %114, %116 : vector<32x256xf32>
    %cst_25 = arith.constant 0.000000e+00 : f32
    %118 = vector.broadcast %cst_25 : f32 to vector<32x256xf32>
    %119 = arith.maximumf %117, %118 : vector<32x256xf32>
    %120 = vector.extract_strided_slice %119 {offsets = [0, 0], sizes = [1, 256], strides = [1, 1]} : vector<32x256xf32> to vector<1x256xf32>
    %121 = vector.extract_strided_slice %119 {offsets = [16, 0], sizes = [1, 256], strides = [1, 1]} : vector<32x256xf32> to vector<1x256xf32>
    %122 = tpu.concatenate %120, %121 in 0 : vector<1x256xf32>, vector<1x256xf32> -> vector<2x256xf32>
    %123 = vector.extract_strided_slice %119 {offsets = [1, 0], sizes = [1, 256], strides = [1, 1]} : vector<32x256xf32> to vector<1x256xf32>
    %124 = vector.extract_strided_slice %119 {offsets = [17, 0], sizes = [1, 256], strides = [1, 1]} : vector<32x256xf32> to vector<1x256xf32>
    %125 = tpu.concatenate %123, %124 in 0 : vector<1x256xf32>, vector<1x256xf32> -> vector<2x256xf32>
    %126 = vector.extract_strided_slice %119 {offsets = [2, 0], sizes = [1, 256], strides = [1, 1]} : vector<32x256xf32> to vector<1x256xf32>
    %127 = vector.extract_strided_slice %119 {offsets = [18, 0], sizes = [1, 256], strides = [1, 1]} : vector<32x256xf32> to vector<1x256xf32>
    %128 = tpu.concatenate %126, %127 in 0 : vector<1x256xf32>, vector<1x256xf32> -> vector<2x256xf32>
    %129 = vector.extract_strided_slice %119 {offsets = [3, 0], sizes = [1, 256], strides = [1, 1]} : vector<32x256xf32> to vector<1x256xf32>
    %130 = vector.extract_strided_slice %119 {offsets = [19, 0], sizes = [1, 256], strides = [1, 1]} : vector<32x256xf32> to vector<1x256xf32>
    %131 = tpu.concatenate %129, %130 in 0 : vector<1x256xf32>, vector<1x256xf32> -> vector<2x256xf32>
    %132 = vector.extract_strided_slice %119 {offsets = [4, 0], sizes = [1, 256], strides = [1, 1]} : vector<32x256xf32> to vector<1x256xf32>
    %133 = vector.extract_strided_slice %119 {offsets = [20, 0], sizes = [1, 256], strides = [1, 1]} : vector<32x256xf32> to vector<1x256xf32>
    %134 = tpu.concatenate %132, %133 in 0 : vector<1x256xf32>, vector<1x256xf32> -> vector<2x256xf32>
    %135 = vector.extract_strided_slice %119 {offsets = [5, 0], sizes = [1, 256], strides = [1, 1]} : vector<32x256xf32> to vector<1x256xf32>
    %136 = vector.extract_strided_slice %119 {offsets = [21, 0], sizes = [1, 256], strides = [1, 1]} : vector<32x256xf32> to vector<1x256xf32>
    %137 = tpu.concatenate %135, %136 in 0 : vector<1x256xf32>, vector<1x256xf32> -> vector<2x256xf32>
    %138 = vector.extract_strided_slice %119 {offsets = [6, 0], sizes = [1, 256], strides = [1, 1]} : vector<32x256xf32> to vector<1x256xf32>
    %139 = vector.extract_strided_slice %119 {offsets = [22, 0], sizes = [1, 256], strides = [1, 1]} : vector<32x256xf32> to vector<1x256xf32>
    %140 = tpu.concatenate %138, %139 in 0 : vector<1x256xf32>, vector<1x256xf32> -> vector<2x256xf32>
    %141 = vector.extract_strided_slice %119 {offsets = [7, 0], sizes = [1, 256], strides = [1, 1]} : vector<32x256xf32> to vector<1x256xf32>
    %142 = vector.extract_strided_slice %119 {offsets = [23, 0], sizes = [1, 256], strides = [1, 1]} : vector<32x256xf32> to vector<1x256xf32>
    %143 = tpu.concatenate %141, %142 in 0 : vector<1x256xf32>, vector<1x256xf32> -> vector<2x256xf32>
    %144 = vector.extract_strided_slice %119 {offsets = [8, 0], sizes = [1, 256], strides = [1, 1]} : vector<32x256xf32> to vector<1x256xf32>
    %145 = vector.extract_strided_slice %119 {offsets = [24, 0], sizes = [1, 256], strides = [1, 1]} : vector<32x256xf32> to vector<1x256xf32>
    %146 = tpu.concatenate %144, %145 in 0 : vector<1x256xf32>, vector<1x256xf32> -> vector<2x256xf32>
    %147 = vector.extract_strided_slice %119 {offsets = [9, 0], sizes = [1, 256], strides = [1, 1]} : vector<32x256xf32> to vector<1x256xf32>
    %148 = vector.extract_strided_slice %119 {offsets = [25, 0], sizes = [1, 256], strides = [1, 1]} : vector<32x256xf32> to vector<1x256xf32>
    %149 = tpu.concatenate %147, %148 in 0 : vector<1x256xf32>, vector<1x256xf32> -> vector<2x256xf32>
    %150 = vector.extract_strided_slice %119 {offsets = [10, 0], sizes = [1, 256], strides = [1, 1]} : vector<32x256xf32> to vector<1x256xf32>
    %151 = vector.extract_strided_slice %119 {offsets = [26, 0], sizes = [1, 256], strides = [1, 1]} : vector<32x256xf32> to vector<1x256xf32>
    %152 = tpu.concatenate %150, %151 in 0 : vector<1x256xf32>, vector<1x256xf32> -> vector<2x256xf32>
    %153 = vector.extract_strided_slice %119 {offsets = [11, 0], sizes = [1, 256], strides = [1, 1]} : vector<32x256xf32> to vector<1x256xf32>
    %154 = vector.extract_strided_slice %119 {offsets = [27, 0], sizes = [1, 256], strides = [1, 1]} : vector<32x256xf32> to vector<1x256xf32>
    %155 = tpu.concatenate %153, %154 in 0 : vector<1x256xf32>, vector<1x256xf32> -> vector<2x256xf32>
    %156 = vector.extract_strided_slice %119 {offsets = [12, 0], sizes = [1, 256], strides = [1, 1]} : vector<32x256xf32> to vector<1x256xf32>
    %157 = vector.extract_strided_slice %119 {offsets = [28, 0], sizes = [1, 256], strides = [1, 1]} : vector<32x256xf32> to vector<1x256xf32>
    %158 = tpu.concatenate %156, %157 in 0 : vector<1x256xf32>, vector<1x256xf32> -> vector<2x256xf32>
    %159 = vector.extract_strided_slice %119 {offsets = [13, 0], sizes = [1, 256], strides = [1, 1]} : vector<32x256xf32> to vector<1x256xf32>
    %160 = vector.extract_strided_slice %119 {offsets = [29, 0], sizes = [1, 256], strides = [1, 1]} : vector<32x256xf32> to vector<1x256xf32>
    %161 = tpu.concatenate %159, %160 in 0 : vector<1x256xf32>, vector<1x256xf32> -> vector<2x256xf32>
    %162 = vector.extract_strided_slice %119 {offsets = [14, 0], sizes = [1, 256], strides = [1, 1]} : vector<32x256xf32> to vector<1x256xf32>
    %163 = vector.extract_strided_slice %119 {offsets = [30, 0], sizes = [1, 256], strides = [1, 1]} : vector<32x256xf32> to vector<1x256xf32>
    %164 = tpu.concatenate %162, %163 in 0 : vector<1x256xf32>, vector<1x256xf32> -> vector<2x256xf32>
    %165 = vector.extract_strided_slice %119 {offsets = [15, 0], sizes = [1, 256], strides = [1, 1]} : vector<32x256xf32> to vector<1x256xf32>
    %166 = vector.extract_strided_slice %119 {offsets = [31, 0], sizes = [1, 256], strides = [1, 1]} : vector<32x256xf32> to vector<1x256xf32>
    %167 = tpu.concatenate %165, %166 in 0 : vector<1x256xf32>, vector<1x256xf32> -> vector<2x256xf32>
    %168 = tpu.concatenate %122, %125, %128, %131, %134, %137, %140, %143, %146, %149, %152, %155, %158, %161, %164, %167 in 1 : vector<2x256xf32>, vector<2x256xf32>, vector<2x256xf32>, vector<2x256xf32>, vector<2x256xf32>, vector<2x256xf32>, vector<2x256xf32>, vector<2x256xf32>, vector<2x256xf32>, vector<2x256xf32>, vector<2x256xf32>, vector<2x256xf32>, vector<2x256xf32>, vector<2x256xf32>, vector<2x256xf32>, vector<2x256xf32> -> vector<2x4096xf32>
    %c0_26 = arith.constant 0 : index
    %c0_27 = arith.constant 0 : index
    %169 = vector.load %arg9[%c0_26, %c0_27] : memref<32x4096xf32, #tpu.memory_space<vmem>>, vector<32x4096xf32>
    %cst_28 = arith.constant dense<0.000000e+00> : vector<2x32xf32>
    %170 = tpu.matmul %168, %169, %cst_28 {dimension_numbers = #tpu.dot_dimension_numbers<[1], [1], [0], [0], [0, 0, 1, 0], [], []>} : vector<2x4096xf32>, vector<32x4096xf32>, vector<2x32xf32> -> vector<2x32xf32>
    %c0_29 = arith.constant 0 : index
    %c0_30 = arith.constant 0 : index
    %171 = vector.load %arg10[%c0_29, %c0_30] : memref<1x32xf32, #tpu.memory_space<vmem>>, vector<1x32xf32>
    %172 = vector.broadcast %171 : vector<1x32xf32> to vector<2x32xf32>
    %173 = arith.addf %170, %172 : vector<2x32xf32>
    %cst_31 = arith.constant 0.000000e+00 : f32
    %174 = vector.broadcast %cst_31 : f32 to vector<2x32xf32>
    %175 = arith.maximumf %173, %174 : vector<2x32xf32>
    %c0_32 = arith.constant 0 : index
    %c0_33 = arith.constant 0 : index
    %176 = vector.load %arg11[%c0_32, %c0_33] : memref<32x10xf32, #tpu.memory_space<vmem>>, vector<32x10xf32>
    %cst_34 = arith.constant dense<0.000000e+00> : vector<2x10xf32>
    %177 = tpu.matmul %175, %176, %cst_34 {dimension_numbers = #tpu.dot_dimension_numbers<[1], [0], [0], [1], [0, 0, 1, 1], [], []>} : vector<2x32xf32>, vector<32x10xf32>, vector<2x10xf32> -> vector<2x10xf32>
    %c0_35 = arith.constant 0 : index
    %c0_36 = arith.constant 0 : index
    %178 = vector.load %arg12[%c0_35, %c0_36] : memref<1x10xf32, #tpu.memory_space<vmem>>, vector<1x10xf32>
    %179 = vector.broadcast %178 : vector<1x10xf32> to vector<2x10xf32>
    %180 = arith.addf %177, %179 : vector<2x10xf32>
    %c0_37 = arith.constant 0 : index
    %c0_38 = arith.constant 0 : index
    %181 = vector.load %arg13[%c0_37, %c0_38] : memref<2x10xf32, #tpu.memory_space<vmem>>, vector<2x10xf32>
    tpu.vector_store %arg13[%c0_37, %c0_38], %180 {strides = array<i32>} : memref<2x10xf32, #tpu.memory_space<vmem>>, vector<2x10xf32>,
    return
  }
  func.func @transform_0(%arg0: i32) -> (i32, i32) {
    %c0_i32 = arith.constant 0 : i32
    %c0_i32_0 = arith.constant 0 : i32
    %c0_i32_1 = arith.constant 0 : i32
    return %c0_i32, %c0_i32_0 : i32, i32
  }
  func.func @transform_1(%arg0: i32) -> (i32, i32) {
    %c0_i32 = arith.constant 0 : i32
    %c0_i32_0 = arith.constant 0 : i32
    %c0_i32_1 = arith.constant 0 : i32
    return %c0_i32, %c0_i32_0 : i32, i32
  }
  func.func @transform_2(%arg0: i32) -> (i32, i32) {
    %c0_i32 = arith.constant 0 : i32
    %c0_i32_0 = arith.constant 0 : i32
    %c0_i32_1 = arith.constant 0 : i32
    return %c0_i32, %c0_i32_0 : i32, i32
  }
  func.func @transform_3(%arg0: i32) -> (i32, i32) {
    %c0_i32 = arith.constant 0 : i32
    %c0_i32_0 = arith.constant 0 : i32
    %c0_i32_1 = arith.constant 0 : i32
    return %c0_i32, %c0_i32_0 : i32, i32
  }
  func.func @transform_4(%arg0: i32) -> (i32, i32) {
    %c0_i32 = arith.constant 0 : i32
    %c0_i32_0 = arith.constant 0 : i32
    %c0_i32_1 = arith.constant 0 : i32
    return %c0_i32, %c0_i32_0 : i32, i32
  }
  func.func @transform_5(%arg0: i32) -> (i32, i32) {
    %c0_i32 = arith.constant 0 : i32
    %c0_i32_0 = arith.constant 0 : i32
    %c0_i32_1 = arith.constant 0 : i32
    return %c0_i32, %c0_i32_0 : i32, i32
  }
  func.func @transform_6(%arg0: i32) -> (i32, i32) {
    %c0_i32 = arith.constant 0 : i32
    %c0_i32_0 = arith.constant 0 : i32
    %c0_i32_1 = arith.constant 0 : i32
    return %c0_i32, %c0_i32_0 : i32, i32
  }
  func.func @transform_7(%arg0: i32) -> (i32, i32) {
    %c0_i32 = arith.constant 0 : i32
    %c0_i32_0 = arith.constant 0 : i32
    %c0_i32_1 = arith.constant 0 : i32
    return %c0_i32, %c0_i32_0 : i32, i32
  }
  func.func @transform_8(%arg0: i32) -> (i32, i32) {
    %c0_i32 = arith.constant 0 : i32
    %c0_i32_0 = arith.constant 0 : i32
    %c0_i32_1 = arith.constant 0 : i32
    return %c0_i32, %c0_i32_0 : i32, i32
  }
  func.func @transform_9(%arg0: i32) -> (i32, i32) {
    %c0_i32 = arith.constant 0 : i32
    %c0_i32_0 = arith.constant 0 : i32
    %c0_i32_1 = arith.constant 0 : i32
    return %c0_i32, %c0_i32_0 : i32, i32
  }
  func.func @transform_10(%arg0: i32) -> (i32, i32) {
    %c0_i32 = arith.constant 0 : i32
    %c0_i32_0 = arith.constant 0 : i32
    %c0_i32_1 = arith.constant 0 : i32
    return %c0_i32, %c0_i32_0 : i32, i32
  }
  func.func @transform_11(%arg0: i32) -> (i32, i32) {
    %c0_i32 = arith.constant 0 : i32
    %c0_i32_0 = arith.constant 0 : i32
    %c0_i32_1 = arith.constant 0 : i32
    return %c0_i32, %c0_i32_0 : i32, i32
  }
  func.func @transform_12(%arg0: i32) -> (i32, i32) {
    %c0_i32 = arith.constant 0 : i32
    %c0_i32_0 = arith.constant 0 : i32
    %c0_i32_1 = arith.constant 0 : i32
    return %c0_i32, %c0_i32_0 : i32, i32
  }
}

</mosaic_0001>

<bundles_post_ra>
// kernel: seqnet_forward.1
= control target key start
LH: loop header
LB: loop body
LE: loop exit
PB: predicated region body
PF: predicated region fallthrough
CT: control target
= control target key end

     0   :  { %17 = vsyncpa [#allocation3], 0  ;;  %s3321_s0 = inlined_call_operand.vmem [shape: f32[8,256], index: 0, kind: input, shape index: {}]   ;;  %s3322_s1 = inlined_call_operand.vmem [shape: f32[8,1], index: 1, kind: input, shape index: {}]   ;;  %s3323_s2 = inlined_call_operand.vmem [shape: f32[16,72], index: 2, kind: input, shape index: {}]   ;;  %s3324_s3 = inlined_call_operand.vmem [shape: f32[16,1], index: 3, kind: input, shape index: {}]   ;;  %s3325_s4 = inlined_call_operand.vmem [shape: f32[9,256], index: 4, kind: input, shape index: {}]   ;;  %s3326_s5 = inlined_call_operand.vmem [shape: f32[32,256], index: 5, kind: input, shape index: {}]   ;;  %s3327_s6 = inlined_call_operand.vmem [shape: f32[32,1], index: 6, kind: input, shape index: {}]   ;;  %s3328_s7 = inlined_call_operand.vmem [shape: f32[16,256], index: 7, kind: input, shape index: {}]   ;;  %s3329_s8 = inlined_call_operand.hbm [shape: f32[32,4096], index: 8, kind: input, shape index: {}]   ;;  %s3330_s9 = inlined_call_operand.vmem [shape: f32[1,32], index: 9, kind: input, shape index: {}]   ;;  %s3331_s10 = inlined_call_operand.vmem [shape: f32[32,10], index: 10, kind: input, shape index: {}]   ;;  %s3332_s11 = inlined_call_operand.vmem [shape: f32[1,10], index: 11, kind: input, shape index: {}]   ;;  %s3333_s12 = inlined_call_operand.hbm [shape: f32[2,10], index: 12, kind: output, shape index: {}]  }
   0x1   :  { %18 = vsyncpa [#allocation4], 0  ;;  %s2434_s21 = smov [#allocation2]  }
   0x2   :  { %s40_s22 = sshll.u32 %s2434_s21, 4  ;;  %s41_s22 = int_to_ptr.vmem [resolvable:$true] %s40_s22 }
   0x3   :  { %s2398_s23 = scalar_lea.vmem %s41_s22, 16384  ;;  %p2403_p1 = scmp.lt.s32.totalorder %s41_s22, %s41_s22 }
   0x4   :  { %p2399_p0 = scmp.ne.s32.totalorder %s41_s22, %s2398_s23  ;;  %p2404_p2 = scmp.lt.s32.totalorder %s2398_s23, %s2398_s23 }
   0x6   :  { %p2405_p3 = por %p2404_p2, %p2403_p1 }
   0x8   :  { %p2406_p4 = pnand %p2405_p3, %p2399_p0 }
   0xa   :  { %2409 = shalt.err (!%p2406_p4)
}
   0xb   :  { %s2435_s24 = smov 4096   ;;  %s2436_s25 = smov 256  }
   0xc   :  { %46 = dma.hbm_to_vmem [thread:$0]  %s3329_s8, 16384, %s41_s22, [#allocation3], %s2435_s24, %s2435_s24, %s2436_s25  }
   0xd   :  { %2430 = dma.done.wait [#allocation3], 16384  }
   0xe   :  { %2431 = vsyncadd [#allocation3], 4294950912  ;;  %v2437_v0 = vmov 0   ;;  %v58_v1 = vld [vmem:[%s3322_s1] sm:$0xff]  ;;  %v57_v3 = vld [vmem:[%s3321_s0 + $0x8] sm:$0xff]  ;;  %s2438_s8 = smov 111   ;;  %v74_v10 = vlaneseq }
   0xf   :  { %2388 = vset.pattern.permute.xlu0 %v2437_v0  ;;  %2389 = vset.pattern.permute.xlu1 %v2437_v0  ;;  %v56_v2 = vld [vmem:[%s3321_s0] sm:$0xff]  ;;  %s2439_s1 = smov 112   ;;  %s2440_s0 = smov 113   ;;  %v2443_v7 = vmov 0.0   ;;  %v221_v9 = vld [vmem:[%s3324_s3 + $0x8] sm:$0xff]  ;;  %vm232_vm8 = vcmask 588800  }
  0x10   :  { %61 = vperm.xlu0 %2388, %v58_v1   ;;  %s2441_s16 = smov 127   ;;  %s2442_s17 = smov 1   ;;  %303 = vmatprep.mubr.f32.mxu0 %v2443_v7  ;;  %v220_v8 = vld [vmem:[%s3324_s3] sm:$0xff]  ;;  %v2576_v11 = vand.u32 127, %v74_v10  ;;  %v2578_v12 = vshrl.u32 %v74_v10, 7  ;;  %v2602_v21 = vld [vmem:[%s3325_s4 + $0x8] sm:$0xff] }
  0x11   :  { %s2444_s18 = smov 15   ;;  %s2445_s19 = smov 16   ;;  %v2344_v14 = vld [vmem:[%s3325_s4 + $0x18] ss:$0 sm:$0xff]  ;;  %v2343_v15 = vld [vmem:[%s3325_s4 + $0x10] ss:$0 sm:$0xff] }
  0x12   :  { %s2446_s20 = smov 17   ;;  %vm205_vm0 = vcmp.lt.s32.totalorder %v2576_v11, 111  ;;  %v2582_v13 = vsub.s32 7, %v2578_v12  ;;  %v2597_v20 = vld [vmem:[%s3325_s4] sm:$0xff]  ;;  %vm188_vm1 = vcmp.lt.s32.totalorder %v2576_v11, 112  ;;  %v2606_v22 = vsub.s32 6, %v2578_v12 }
  0x13   :  { %vm171_vm2 = vcmp.lt.s32.totalorder %v2576_v11, 113  ;;  %v2622_v35 = vsub.s32 5, %v2578_v12  ;;  %v2625_v38 = vsub.s32 4, %v2578_v12  ;;  %vm154_vm3 = vcmp.lt.s32.totalorder %v2576_v11, 127  ;;  %s2447_s22 = smov 126   ;;  %s2449_s23 = smov 94  }
  0x14   :  { %v194_v24 = vrot.slane %v2597_v20, %v2582_v13  ;;  %v198_v25 = vrot.slane %v2602_v21, %v2582_v13  ;;  %v177_v31 = vrot.slane %v2597_v20, %v2606_v22  ;;  %v181_v34 = vrot.slane %v2602_v21, %v2606_v22  ;;  %s2450_s24 = smov 95   ;;  %s2451_s25 = smov 96  }
  0x15   :  { %v2633_v41 = vsub.s32 3, %v2578_v12  ;;  %v160_v44 = vrot.slane %v2597_v20, %v2622_v35  ;;  %v164_v45 = vrot.slane %v2602_v21, %v2622_v35  ;;  %v147_v48 = vrot.slane %v2602_v21, %v2625_v38  ;;  %s2452_s26 = smov 97   ;;  %s2453_s27 = smov 110  }
  0x16   :  { %v143_v49 = vrot.slane %v2597_v20, %v2625_v38  ;;  %vm127_vm4 = vcmp.lt.s32.totalorder %v2576_v11, 1  ;;  %v2653_v56 = vsub.s32 2, %v2578_v12  ;;  %vm110_vm5 = vcmp.lt.s32.totalorder %v2576_v11, 15  ;;  %s2455_s14 = smov [#allocation5]  }
  0x17   :  { %v133_v52 = vrot.slane %v2597_v20, %v2633_v41  ;;  %v137_v55 = vrot.slane %v2602_v21, %v2633_v41  ;;  %v2663_v63 = vsub.s32 1, %v2578_v12  ;;  %vm93_vm6 = vcmp.lt.s32.totalorder %v2576_v11, 16  ;;  %s2334_s15 = sshll.u32 %s2455_s14, 4  ;;  %s2335_s15 = int_to_ptr.vmem [resolvable:$true] %s2334_s15 }
  0x18   :  { %vm76_vm7 = vcmp.lt.s32.totalorder %v2576_v11, 17  ;;  %vm489_vm9 = vcmp.lt.s32.totalorder %v2576_v11, 126  ;;  %vm404_vm10 = vcmp.lt.s32.totalorder %v2576_v11, 14  ;;  %vm686_vm11 = vcmp.lt.s32.totalorder %v2576_v11, 94  ;;  %s2410_s21 = scalar_lea.vmem %s2335_s15, 32  ;;  %p2415_p6 = scmp.lt.s32.totalorder %s2335_s15, %s2335_s15 }
  0x19   :  { %vm661_vm12 = vcmp.lt.s32.totalorder %v2576_v11, 95  ;;  %vm636_vm13 = vcmp.lt.s32.totalorder %v2576_v11, 96  ;;  %vm611_vm14 = vcmp.lt.s32.totalorder %v2576_v11, 97  ;;  %vm586_vm15 = vcmp.lt.s32.totalorder %v2576_v11, 110  ;;  %v705_v11 = vld [vmem:[%s3326_s5 + $0x10] sm:$0xff]  ;;  %p2411_p5 = scmp.ne.s32.totalorder %s2335_s15, %s2410_s21  ;;  %p2416_p7 = scmp.lt.s32.totalorder %s2410_s21, %s2410_s21 }
  0x1b   :  { %p2417_p8 = por %p2416_p7, %p2415_p6 }
  0x1d   :  { %p2418_p9 = pnand %p2417_p8, %p2411_p5 }
  0x8b   :  { %v62_v4 = vpop.permute.xlu0 %61 }
  0x8c   :  { %v2533_v5 = vsub.f32 %v56_v2, %v62_v4  ;;  %v2535_v6 = vsub.f32 %v57_v3, %v62_v4  ;;  %v116_v2 = vrot.slane %v2597_v20, %v2653_v56  ;;  %v120_v3 = vrot.slane %v2602_v21, %v2653_v56 }
  0x8e   :  { %203 = vrot.lane.b32.xlu1 %v2535_v6, %s2438_s8  ;;  %201 = vrot.lane.b32.xlu0 %v2533_v5, %s2438_s8  ;;  %v149_v59 = vmul.f32 %v147_v48, %v2535_v6  ;;  %v148_v60 = vmul.f32 %v143_v49, %v2533_v5 }
  0x92   :  { %184 = vrot.lane.b32.xlu1 %v2533_v5, %s2439_s1  ;;  %186 = vrot.lane.b32.xlu0 %v2535_v6, %s2439_s1 }
  0x96   :  { %167 = vrot.lane.b32.xlu1 %v2533_v5, %s2440_s0  ;;  %169 = vrot.lane.b32.xlu0 %v2535_v6, %s2440_s0 }
  0x9a   :  { %150 = vrot.lane.b32.xlu1 %v2533_v5, %s2441_s16  ;;  %152 = vrot.lane.b32.xlu0 %v2535_v6, %s2441_s16 }
  0x9e   :  { %123 = vrot.lane.b32.xlu1 %v2533_v5, %s2442_s17  ;;  %125 = vrot.lane.b32.xlu0 %v2535_v6, %s2442_s17 }
  0xa2   :  { %106 = vrot.lane.b32.xlu1 %v2533_v5, %s2444_s18  ;;  %108 = vrot.lane.b32.xlu0 %v2535_v6, %s2444_s18 }
  0xa6   :  { %89 = vrot.lane.b32.xlu1 %v2533_v5, %s2445_s19  ;;  %91 = vrot.lane.b32.xlu0 %v2535_v6, %s2445_s19 }
  0xaa   :  { %70 = vrot.lane.b32.xlu1 %v2533_v5, %s2446_s20  ;;  %72 = vrot.lane.b32.xlu0 %v2535_v6, %s2446_s20 }
  0xae   :  { %224 = vperm.xlu0 %2388, %v220_v8   ;;  %229 = vperm.xlu1 %2389, %v221_v9   ;;  %v99_v9 = vrot.slane %v2597_v20, %v2663_v63 }
 0x100   :  { %v204_v16 = vpop.permute.xlu1 %203  ;;  %v202_v17 = vpop.permute.xlu0 %201 }
 0x101   :  { %v206_v18 = vsel %vm205_vm0, %v202_v17, %v204_v16  ;;  %v207_v19 = vsel %vm205_vm0, %v204_v16, %v202_v17  ;;  %v2679_v16 = vsub.s32 0, %v2578_v12 }
 0x102   :  { %v217_v23 = vmul.f32 %v2344_v14, %v207_v19  ;;  %v216_v26 = vmul.f32 %v2343_v15, %v206_v18  ;;  %v103_v15 = vrot.slane %v2602_v21, %v2663_v63 }
 0x103   :  { %v86_v12 = vrot.slane %v2602_v21, %v2679_v16 }
 0x104   :  { %v185_v27 = vpop.permute.xlu1 %184  ;;  %253 = vmatprep.subr.mxu0 %v217_v23  ;;  %v187_v28 = vpop.permute.xlu0 %186 }
 0x105   :  { %v189_v29 = vsel %vm188_vm1, %v185_v27, %v187_v28  ;;  %v190_v30 = vsel %vm188_vm1, %v187_v28, %v185_v27  ;;  %254 = vmatpush1.msra.mxu0 %v216_v26  ;;  %v82_v26 = vrot.slane %v2597_v20, %v2679_v16  ;;  %v219_v20 = vld [vmem:[%s3323_s2 + $0x8] sm:$0xff] }
 0x106   :  { %v199_v32 = vmul.f32 %v194_v24, %v189_v29  ;;  %v200_v33 = vmul.f32 %v198_v25, %v190_v30 }
 0x108   :  { %v168_v36 = vpop.permute.xlu1 %167  ;;  %255 = vmatprep.subr.mxu0 %v200_v33  ;;  %v170_v37 = vpop.permute.xlu0 %169  ;;  %v218_v33 = vld [vmem:[%s3323_s2] sm:$0xff]  ;;  %s2448_s2 = smov 14  }
 0x109   :  { %v172_v39 = vsel %vm171_vm2, %v168_v36, %v170_v37  ;;  %v173_v40 = vsel %vm171_vm2, %v170_v37, %v168_v36  ;;  %256 = vmatpush1.msra.mxu0 %v199_v32 }
 0x10a   :  { %v182_v42 = vmul.f32 %v177_v31, %v172_v39  ;;  %v183_v43 = vmul.f32 %v181_v34, %v173_v40 }
 0x10c   :  { %v151_v46 = vpop.permute.xlu1 %150  ;;  %257 = vmatprep.subr.mxu0 %v183_v43  ;;  %v153_v47 = vpop.permute.xlu0 %152 }
 0x10d   :  { %v155_v50 = vsel %vm154_vm3, %v151_v46, %v153_v47  ;;  %v156_v51 = vsel %vm154_vm3, %v153_v47, %v151_v46  ;;  %258 = vmatpush1.msra.mxu0 %v182_v42 }
 0x10e   :  { %v165_v53 = vmul.f32 %v160_v44, %v155_v50  ;;  %v166_v54 = vmul.f32 %v164_v45, %v156_v51  ;;  %v704_v50 = vld [vmem:[%s3326_s5 + $0x8] sm:$0xff] }
 0x10f   :  { %799 = vmatprep.mubr.f32.mxu1 %v704_v50 }
 0x110   :  { %v124_v57 = vpop.permute.xlu1 %123  ;;  %259 = vmatprep.subr.mxu0 %v166_v54  ;;  %v126_v58 = vpop.permute.xlu0 %125 }
 0x111   :  { %v128_v61 = vsel %vm127_vm4, %v124_v57, %v126_v58  ;;  %v129_v62 = vsel %vm127_vm4, %v126_v58, %v124_v57  ;;  %260 = vmatpush1.msra.mxu0 %v165_v53  ;;  %v713_v53 = vld [vmem:[%s3327_s6 + $0x10] sm:$0xff]  ;;  %v714_v58 = vld [vmem:[%s3327_s6 + $0x18] sm:$0xff] }
 0x112   :  { %v138_v0 = vmul.f32 %v133_v52, %v129_v62  ;;  %v139_v1 = vmul.f32 %v137_v55, %v128_v61  ;;  %261 = vmatprep.subr.mxu0 %v149_v59  ;;  %v711_v55 = vld [vmem:[%s3327_s6] sm:$0xff] }
 0x113   :  { %262 = vmatpush1.msra.mxu0 %v148_v60  ;;  %v712_v60 = vld [vmem:[%s3327_s6 + $0x8] sm:$0xff] }
 0x114   :  { %v107_v4 = vpop.permute.xlu1 %106  ;;  %v109_v5 = vpop.permute.xlu0 %108  ;;  %263 = vmatprep.subr.mxu0 %v139_v1 }
 0x115   :  { %v111_v6 = vsel %vm110_vm5, %v107_v4, %v109_v5  ;;  %v112_v8 = vsel %vm110_vm5, %v109_v5, %v107_v4  ;;  %264 = vmatpush1.msra.mxu0 %v138_v0 }
 0x116   :  { %v121_v10 = vmul.f32 %v116_v2, %v112_v8  ;;  %v122_v14 = vmul.f32 %v120_v3, %v111_v6 }
 0x118   :  { %v90_v17 = vpop.permute.xlu1 %89  ;;  %v92_v18 = vpop.permute.xlu0 %91  ;;  %265 = vmatprep.subr.mxu0 %v122_v14 }
 0x119   :  { %v94_v19 = vsel %vm93_vm6, %v90_v17, %v92_v18  ;;  %v95_v23 = vsel %vm93_vm6, %v92_v18, %v90_v17  ;;  %266 = vmatpush1.msra.mxu0 %v121_v10 }
 0x11a   :  { %v104_v24 = vmul.f32 %v99_v9, %v95_v23  ;;  %v105_v25 = vmul.f32 %v103_v15, %v94_v19 }
 0x11c   :  { %v71_v27 = vpop.permute.xlu1 %70  ;;  %v73_v28 = vpop.permute.xlu0 %72  ;;  %267 = vmatprep.subr.mxu0 %v105_v25 }
 0x11d   :  { %v77_v29 = vsel %vm76_vm7, %v71_v27, %v73_v28  ;;  %v78_v30 = vsel %vm76_vm7, %v73_v28, %v71_v27  ;;  %268 = vmatpush1.msra.mxu0 %v104_v24  ;;  %v2892_v27 = vld [vmem:[%s3328_s7] sm:$0xff]  ;;  %v2897_v28 = vld [vmem:[%s3328_s7 + $0x8] sm:$0xff] }
 0x11e   :  { %v87_v31 = vmul.f32 %v82_v26, %v78_v30  ;;  %v88_v32 = vmul.f32 %v86_v12, %v77_v29  ;;  %v497_v29 = vrot.slane %v2892_v27, %v2582_v13 }
 0x120   :  { %269 = vmatprep.subr.mxu0 %v88_v32 }
 0x121   :  { %270 = vmatpush1.msra.mxu0 %v87_v31  ;;  %v501_v31 = vrot.slane %v2897_v28, %v2582_v13 }
 0x122   :  { %2345 = vmatmul.mubr.msk.f32.vlgmr.msra.gmra.mxu0 %vm232_vm8, %v218_v33 }
 0x123   :  { %309 = vmatprep.mubr.f32.mxu0 %v2443_v7 }
 0x126   :  { %2346 = vmatmul.mubr.msk.f32.gmra.mxu0 %vm232_vm8, %v219_v20 }
 0x129   :  { %v225_v21 = vpop.permute.xlu0 %224  ;;  %v230_v44 = vpop.permute.xlu1 %229 }
 0x1e2   :  { %v305_v34 = vpop.f32.mrf.mxu0 }
 0x1e3   :  { %v306_v36 = vadd.f32 %v305_v34, %v225_v21 }
 0x1e4   :  { %v307_v37 = vpop.f32.mrf.mxu0 }
 0x1e5   :  { %v2701_v39 = vmax.f32 %v306_v36, 0.0  ;;  %v308_v40 = vadd.f32 %v307_v37, %v225_v21 }
 0x1e6   :  { %v311_v43 = vpop.f32.mrf.mxu0 }
 0x1e7   :  { %v2703_v42 = vmax.f32 %v308_v40, 0.0  ;;  %481 = vrot.lane.b32.xlu1 %v2701_v39, %s2447_s22  ;;  %v312_v45 = vadd.f32 %v311_v43, %v230_v44  ;;  %v472_v40 = vrot.slane %v2892_v27, %v2606_v22  ;;  %v476_v43 = vrot.slane %v2897_v28, %v2606_v22 }
 0x1e8   :  { %v313_v46 = vpop.f32.mrf.mxu0 }
 0x1e9   :  { %485 = vrot.lane.b32.xlu0 %v2703_v42, %s2447_s22  ;;  %v2753_v47 = vmax.f32 %v312_v45, 0.0  ;;  %v314_v48 = vadd.f32 %v313_v46, %v230_v44 }
 0x1eb   :  { %457 = vrot.lane.b32.xlu1 %v2701_v39, %s2441_s16  ;;  %v2759_v49 = vmax.f32 %v314_v48, 0.0 }
 0x1ed   :  { %461 = vrot.lane.b32.xlu0 %v2703_v42, %s2441_s16 }
 0x1ef   :  { %421 = vrot.lane.b32.xlu1 %v2701_v39, %s2442_s17 }
 0x1f1   :  { %425 = vrot.lane.b32.xlu0 %v2703_v42, %s2442_s17 }
 0x1f3   :  { %396 = vrot.lane.b32.xlu1 %v2701_v39, %s2448_s2 }
 0x1f5   :  { %400 = vrot.lane.b32.xlu0 %v2703_v42, %s2448_s2 }
 0x1f7   :  { %372 = vrot.lane.b32.xlu1 %v2701_v39, %s2444_s18 }
 0x1f9   :  { %376 = vrot.lane.b32.xlu0 %v2703_v42, %s2444_s18 }
 0x1fb   :  { %348 = vrot.lane.b32.xlu1 %v2701_v39, %s2445_s19 }
 0x1fd   :  { %352 = vrot.lane.b32.xlu0 %v2703_v42, %s2445_s19 }
 0x1ff   :  { %324 = vrot.lane.b32.xlu1 %v2701_v39, %s2446_s20 }
 0x201   :  { %328 = vrot.lane.b32.xlu0 %v2703_v42, %s2446_s20 }
 0x203   :  { %678 = vrot.lane.b32.xlu1 %v2701_v39, %s2449_s23 }
 0x205   :  { %682 = vrot.lane.b32.xlu0 %v2703_v42, %s2449_s23 }
 0x207   :  { %653 = vrot.lane.b32.xlu1 %v2701_v39, %s2450_s24 }
 0x209   :  { %657 = vrot.lane.b32.xlu0 %v2703_v42, %s2450_s24 }
 0x20b   :  { %628 = vrot.lane.b32.xlu1 %v2701_v39, %s2451_s25 }
 0x20d   :  { %632 = vrot.lane.b32.xlu0 %v2703_v42, %s2451_s25 }
 0x20f   :  { %603 = vrot.lane.b32.xlu1 %v2701_v39, %s2452_s26 }
 0x211   :  { %607 = vrot.lane.b32.xlu0 %v2703_v42, %s2452_s26 }
 0x213   :  { %578 = vrot.lane.b32.xlu1 %v2701_v39, %s2453_s27 }
 0x215   :  { %582 = vrot.lane.b32.xlu0 %v2703_v42, %s2453_s27 }
 0x217   :  { %554 = vrot.lane.b32.xlu1 %v2701_v39, %s2438_s8 }
 0x219   :  { %558 = vrot.lane.b32.xlu0 %v2703_v42, %s2438_s8 }
 0x21b   :  { %483 = vrot.lane.b32.xlu1 %v2753_v47, %s2447_s22 }
 0x21d   :  { %487 = vrot.lane.b32.xlu0 %v2759_v49, %s2447_s22 }
 0x21f   :  { %459 = vrot.lane.b32.xlu1 %v2753_v47, %s2441_s16 }
 0x221   :  { %463 = vrot.lane.b32.xlu0 %v2759_v49, %s2441_s16 }
 0x223   :  { %530 = vrot.lane.b32.xlu1 %v2701_v39, %s2439_s1 }
 0x225   :  { %534 = vrot.lane.b32.xlu0 %v2703_v42, %s2439_s1 }
 0x227   :  { %423 = vrot.lane.b32.xlu1 %v2753_v47, %s2442_s17 }
 0x229   :  { %427 = vrot.lane.b32.xlu0 %v2759_v49, %s2442_s17 }
 0x22b   :  { %398 = vrot.lane.b32.xlu1 %v2753_v47, %s2448_s2 }
 0x22d   :  { %402 = vrot.lane.b32.xlu0 %v2759_v49, %s2448_s2 }
 0x22f   :  { %374 = vrot.lane.b32.xlu1 %v2753_v47, %s2444_s18 }
 0x231   :  { %378 = vrot.lane.b32.xlu0 %v2759_v49, %s2444_s18 }
 0x233   :  { %350 = vrot.lane.b32.xlu1 %v2753_v47, %s2445_s19 }
 0x235   :  { %354 = vrot.lane.b32.xlu0 %v2759_v49, %s2445_s19 }
 0x237   :  { %326 = vrot.lane.b32.xlu1 %v2753_v47, %s2446_s20 }
 0x239   :  { %330 = vrot.lane.b32.xlu0 %v2759_v49, %s2446_s20 }
 0x23b   :  { %680 = vrot.lane.b32.xlu1 %v2753_v47, %s2449_s23 }
 0x23d   :  { %684 = vrot.lane.b32.xlu0 %v2759_v49, %s2449_s23 }
 0x23f   :  { %655 = vrot.lane.b32.xlu1 %v2753_v47, %s2450_s24 }
 0x241   :  { %659 = vrot.lane.b32.xlu0 %v2759_v49, %s2450_s24 }
 0x243   :  { %630 = vrot.lane.b32.xlu1 %v2753_v47, %s2451_s25 }
 0x245   :  { %634 = vrot.lane.b32.xlu0 %v2759_v49, %s2451_s25 }
 0x247   :  { %605 = vrot.lane.b32.xlu1 %v2753_v47, %s2452_s26 }
 0x249   :  { %609 = vrot.lane.b32.xlu0 %v2759_v49, %s2452_s26 }
 0x24b   :  { %580 = vrot.lane.b32.xlu1 %v2753_v47, %s2453_s27 }
 0x24d   :  { %584 = vrot.lane.b32.xlu0 %v2759_v49, %s2453_s27 }
 0x24f   :  { %556 = vrot.lane.b32.xlu1 %v2753_v47, %s2438_s8 }
 0x251   :  { %560 = vrot.lane.b32.xlu0 %v2759_v49, %s2438_s8 }
 0x253   :  { %532 = vrot.lane.b32.xlu1 %v2753_v47, %s2439_s1 }
 0x255   :  { %536 = vrot.lane.b32.xlu0 %v2759_v49, %s2439_s1 }
 0x257   :  { %508 = vrot.lane.b32.xlu1 %v2753_v47, %s2440_s0 }
 0x259   :  { %512 = vrot.lane.b32.xlu0 %v2759_v49, %s2440_s0  ;;  %v482_v51 = vpop.permute.xlu1 %481 }
 0x25b   :  { %v486_v52 = vpop.permute.xlu0 %485  ;;  %506 = vrot.lane.b32.xlu1 %v2701_v39, %s2440_s0 }
 0x25c   :  { %v492_v32 = vsel %vm489_vm9, %v486_v52, %v482_v51  ;;  %v490_v21 = vsel %vm489_vm9, %v482_v51, %v486_v52 }
 0x25d   :  { %510 = vrot.lane.b32.xlu0 %v2703_v42, %s2440_s0  ;;  %v458_v54 = vpop.permute.xlu1 %457  ;;  %v503_v45 = vmul.f32 %v501_v31, %v492_v32  ;;  %v502_v46 = vmul.f32 %v497_v29, %v490_v21 }
 0x25f   :  { %v462_v57 = vpop.permute.xlu0 %461  ;;  %727 = vperm.xlu1 %2389, %v713_v53  }
 0x260   :  { %v467_v48 = vsel %vm154_vm3, %v462_v57, %v458_v54  ;;  %v465_v52 = vsel %vm154_vm3, %v458_v54, %v462_v57 }
 0x261   :  { %717 = vperm.xlu0 %2388, %v711_v55   ;;  %v2841_v59 = vpop.permute.xlu1 %421 }
 0x263   :  { %v2846_v61 = vpop.permute.xlu0 %425  ;;  %732 = vperm.xlu1 %2389, %v714_v58  }
 0x265   :  { %722 = vperm.xlu0 %2388, %v712_v60   ;;  %v2848_v62 = vpop.permute.xlu1 %396  ;;  %v478_v60 = vmul.f32 %v476_v43, %v467_v48  ;;  %v416_v48 = vrot.slane %v2897_v28, %v2633_v41 }
 0x267   :  { %v2850_v0 = vpop.permute.xlu0 %400 }
 0x269   :  { %v2852_v1 = vpop.permute.xlu1 %372 }
 0x26b   :  { %v2854_v2 = vpop.permute.xlu0 %376 }
 0x26d   :  { %v2856_v3 = vpop.permute.xlu1 %348 }
 0x26f   :  { %v2858_v4 = vpop.permute.xlu0 %352 }
 0x271   :  { %v2860_v5 = vpop.permute.xlu1 %324 }
 0x273   :  { %v2862_v6 = vpop.permute.xlu0 %328 }
 0x275   :  { %v2864_v8 = vpop.permute.xlu1 %678 }
 0x277   :  { %v2866_v9 = vpop.permute.xlu0 %682 }
 0x279   :  { %v2868_v10 = vpop.permute.xlu1 %653 }
 0x27b   :  { %v2870_v14 = vpop.permute.xlu0 %657 }
 0x27d   :  { %v2872_v15 = vpop.permute.xlu1 %628 }
 0x27f   :  { %v2874_v17 = vpop.permute.xlu0 %632 }
 0x281   :  { %v2876_v18 = vpop.permute.xlu1 %603 }
 0x283   :  { %v2878_v19 = vpop.permute.xlu0 %607 }
 0x285   :  { %v2880_v23 = vpop.permute.xlu1 %578 }
 0x287   :  { %v2882_v24 = vpop.permute.xlu0 %582 }
 0x289   :  { %v2884_v25 = vpop.permute.xlu1 %554 }
 0x28b   :  { %v2886_v26 = vpop.permute.xlu0 %558 }
 0x28d   :  { %v484_v12 = vpop.permute.xlu1 %483 }
 0x28f   :  { %v488_v30 = vpop.permute.xlu0 %487 }
 0x290   :  { %v491_v33 = vsel %vm489_vm9, %v484_v12, %v488_v30  ;;  %v493_v20 = vsel %vm489_vm9, %v488_v30, %v484_v12  ;;  %v477_v30 = vmul.f32 %v472_v40, %v465_v52  ;;  %v407_v52 = vsel %vm404_vm10, %v2850_v0, %v2848_v62 }
 0x291   :  { %v460_v34 = vpop.permute.xlu1 %459  ;;  %v505_v36 = vmul.f32 %v501_v31, %v493_v20  ;;  %v504_v37 = vmul.f32 %v497_v29, %v491_v33  ;;  %v452_v29 = vrot.slane %v2897_v28, %v2622_v35  ;;  %v448_v31 = vrot.slane %v2892_v27, %v2622_v35 }
 0x292   :  { %v436_v33 = vrot.slane %v2892_v27, %v2625_v38  ;;  %v440_v20 = vrot.slane %v2897_v28, %v2625_v38 }
 0x293   :  { %v464_v44 = vpop.permute.xlu0 %463  ;;  %735 = vmatprep.subr.mxu1 %v505_v36  ;;  %v456_v57 = vmul.f32 %v452_v29, %v2759_v49  ;;  %v455_v32 = vmul.f32 %v448_v31, %v2753_v47  ;;  %v429_v36 = vsel %vm127_vm4, %v2841_v59, %v2846_v61 }
 0x294   :  { %v466_v50 = vsel %vm154_vm3, %v460_v34, %v464_v44  ;;  %v468_v51 = vsel %vm154_vm3, %v464_v44, %v460_v34  ;;  %736 = vmatpush1.msra.mxu1 %v504_v37  ;;  %v454_v34 = vmul.f32 %v452_v29, %v2703_v42  ;;  %v453_v37 = vmul.f32 %v448_v31, %v2701_v39 }
 0x295   :  { %v479_v53 = vmul.f32 %v472_v40, %v466_v50  ;;  %v480_v55 = vmul.f32 %v476_v43, %v468_v51  ;;  %737 = vmatprep.subr.mxu1 %v503_v45  ;;  %v2915_v58 = vpop.permute.xlu1 %530  ;;  %v431_v40 = vsel %vm127_vm4, %v2846_v61, %v2841_v59  ;;  %v442_v45 = vmul.f32 %v440_v20, %v429_v36 }
 0x296   :  { %738 = vmatpush1.msra.mxu1 %v502_v46  ;;  %v412_v46 = vrot.slane %v2892_v27, %v2633_v41  ;;  %v441_v50 = vmul.f32 %v436_v33, %v431_v40  ;;  %v405_v59 = vsel %vm404_vm10, %v2848_v62, %v2850_v0  ;;  %v391_v31 = vrot.slane %v2897_v28, %v2653_v56 }
 0x297   :  { %v2917_v12 = vpop.permute.xlu0 %534  ;;  %739 = vmatprep.subr.mxu1 %v480_v55  ;;  %v418_v29 = vmul.f32 %v416_v48, %v405_v59  ;;  %v380_v62 = vsel %vm110_vm5, %v2852_v1, %v2854_v2  ;;  %vm2326_vm3 = vcmask 74752  }
 0x298   :  { %740 = vmatpush1.msra.mxu1 %v479_v53  ;;  %v393_v36 = vmul.f32 %v391_v31, %v380_v62 }
 0x299   :  { %741 = vmatprep.subr.mxu1 %v478_v60  ;;  %v424_v54 = vpop.permute.xlu1 %423 }
 0x29a   :  { %742 = vmatpush1.msra.mxu1 %v477_v30  ;;  %v387_v30 = vrot.slane %v2892_v27, %v2653_v56 }
 0x29b   :  { %v428_v21 = vpop.permute.xlu0 %427  ;;  %743 = vmatprep.subr.mxu1 %v456_v57  ;;  %v417_v57 = vmul.f32 %v412_v46, %v407_v52  ;;  %v334_v52 = vsel %vm76_vm7, %v2862_v6, %v2860_v5 }
 0x29c   :  { %v430_v49 = vsel %vm127_vm4, %v424_v54, %v428_v21  ;;  %v432_v47 = vsel %vm127_vm4, %v428_v21, %v424_v54  ;;  %744 = vmatpush1.msra.mxu1 %v455_v32 }
 0x29d   :  { %v443_v42 = vmul.f32 %v436_v33, %v432_v47  ;;  %v444_v43 = vmul.f32 %v440_v20, %v430_v49  ;;  %745 = vmatprep.subr.mxu1 %v454_v34  ;;  %v399_v44 = vpop.permute.xlu1 %398  ;;  %v382_v33 = vsel %vm110_vm5, %v2854_v2, %v2852_v1  ;;  %v363_v49 = vrot.slane %v2892_v27, %v2663_v63 }
 0x29e   :  { %746 = vmatpush1.msra.mxu1 %v453_v37  ;;  %v367_v47 = vrot.slane %v2897_v28, %v2663_v63  ;;  %v392_v40 = vmul.f32 %v387_v30, %v382_v33  ;;  %v356_v1 = vsel %vm93_vm6, %v2856_v3, %v2858_v4 }
 0x29f   :  { %v403_v39 = vpop.permute.xlu0 %402  ;;  %747 = vmatprep.subr.mxu1 %v444_v43  ;;  %v358_v43 = vsel %vm93_vm6, %v2858_v4, %v2856_v3  ;;  %v332_v3 = vsel %vm76_vm7, %v2860_v5, %v2862_v6  ;;  %v3003_v4 = vld [vmem:[%s3328_s7 + $0x10] sm:$0xff]  ;;  %v689_v5 = vsel %vm686_vm11, %v2866_v9, %v2864_v8 }
 0x2a0   :  { %v406_v61 = vsel %vm404_vm10, %v399_v44, %v403_v39  ;;  %v408_v51 = vsel %vm404_vm10, %v403_v39, %v399_v44  ;;  %748 = vmatpush1.msra.mxu1 %v443_v42  ;;  %v339_v39 = vrot.slane %v2892_v27, %v2679_v16  ;;  %v3008_v27 = vld [vmem:[%s3328_s7 + $0x18] sm:$0xff] }
 0x2a1   :  { %v419_v53 = vmul.f32 %v412_v46, %v408_v51  ;;  %v420_v55 = vmul.f32 %v416_v48, %v406_v61  ;;  %v375_v60 = vpop.permute.xlu1 %374  ;;  %749 = vmatprep.subr.mxu1 %v442_v45  ;;  %v369_v48 = vmul.f32 %v367_v47, %v356_v1  ;;  %v368_v61 = vmul.f32 %v363_v49, %v358_v43 }
 0x2a2   :  { %750 = vmatpush1.msra.mxu1 %v441_v50  ;;  %v343_v50 = vrot.slane %v2897_v28, %v2679_v16  ;;  %v648_v43 = vrot.slane %v3008_v27, %v2622_v35 }
 0x2a3   :  { %v379_v54 = vpop.permute.xlu0 %378  ;;  %751 = vmatprep.subr.mxu1 %v420_v55 }
 0x2a4   :  { %v381_v0 = vsel %vm110_vm5, %v375_v60, %v379_v54  ;;  %v383_v32 = vsel %vm110_vm5, %v379_v54, %v375_v60  ;;  %752 = vmatpush1.msra.mxu1 %v419_v53 }
 0x2a5   :  { %v394_v20 = vmul.f32 %v387_v30, %v383_v32  ;;  %v395_v21 = vmul.f32 %v391_v31, %v381_v0  ;;  %v351_v34 = vpop.permute.xlu1 %350  ;;  %753 = vmatprep.subr.mxu1 %v418_v29  ;;  %v345_v29 = vmul.f32 %v343_v50, %v332_v3  ;;  %v694_v30 = vrot.slane %v3003_v4, %v2582_v13 }
 0x2a6   :  { %754 = vmatpush1.msra.mxu1 %v417_v57  ;;  %v698_v31 = vrot.slane %v3008_v27, %v2582_v13  ;;  %v344_v57 = vmul.f32 %v339_v39, %v334_v52  ;;  %v687_v13 = vsel %vm686_vm11, %v2864_v8, %v2866_v9  ;;  %v664_v8 = vsel %vm661_vm12, %v2870_v14, %v2868_v10 }
 0x2a7   :  { %v355_v37 = vpop.permute.xlu0 %354  ;;  %755 = vmatprep.subr.mxu1 %v395_v21  ;;  %v669_v21 = vrot.slane %v3003_v4, %v2606_v22  ;;  %v623_v3 = vrot.slane %v3008_v27, %v2625_v38 }
 0x2a8   :  { %v357_v2 = vsel %vm93_vm6, %v351_v34, %v355_v37  ;;  %v359_v42 = vsel %vm93_vm6, %v355_v37, %v351_v34  ;;  %756 = vmatpush1.msra.mxu1 %v394_v20  ;;  %v700_v20 = vmul.f32 %v698_v31, %v689_v5  ;;  %v673_v34 = vrot.slane %v3008_v27, %v2606_v22 }
 0x2a9   :  { %v370_v44 = vmul.f32 %v363_v49, %v359_v42  ;;  %v371_v45 = vmul.f32 %v367_v47, %v357_v2  ;;  %v327_v46 = vpop.permute.xlu1 %326  ;;  %757 = vmatprep.subr.mxu1 %v393_v36  ;;  %v699_v49 = vmul.f32 %v694_v30, %v687_v13  ;;  %v662_v22 = vsel %vm661_vm12, %v2868_v10, %v2870_v14 }
 0x2aa   :  { %758 = vmatpush1.msra.mxu1 %v392_v40  ;;  %v675_v2 = vmul.f32 %v673_v34, %v664_v8  ;;  %v644_v42 = vrot.slane %v3003_v4, %v2622_v35  ;;  %v639_v10 = vsel %vm636_vm13, %v2874_v17, %v2872_v15  ;;  %v637_v35 = vsel %vm636_vm13, %v2872_v15, %v2874_v17 }
 0x2ab   :  { %v331_v59 = vpop.permute.xlu0 %330  ;;  %759 = vmatprep.subr.mxu1 %v371_v45  ;;  %v674_v45 = vmul.f32 %v669_v21, %v662_v22  ;;  %v614_v15 = vsel %vm611_vm14, %v2878_v19, %v2876_v18  ;;  %v549_v22 = vrot.slane %v3008_v27, %v2663_v63 }
 0x2ac   :  { %v333_v28 = vsel %vm76_vm7, %v327_v46, %v331_v59  ;;  %v335_v51 = vsel %vm76_vm7, %v331_v59, %v327_v46  ;;  %760 = vmatpush1.msra.mxu1 %v370_v44  ;;  %v650_v59 = vmul.f32 %v648_v43, %v639_v10 }
 0x2ad   :  { %v346_v53 = vmul.f32 %v339_v39, %v335_v51  ;;  %v347_v55 = vmul.f32 %v343_v50, %v333_v28  ;;  %v681_v60 = vpop.permute.xlu1 %680  ;;  %761 = vmatprep.subr.mxu1 %v369_v48  ;;  %v649_v51 = vmul.f32 %v644_v42, %v637_v35 }
 0x2ae   :  { %762 = vmatpush1.msra.mxu1 %v368_v61  ;;  %v619_v61 = vrot.slane %v3003_v4, %v2625_v38  ;;  %v612_v38 = vsel %vm611_vm14, %v2876_v18, %v2878_v19  ;;  %v589_v18 = vsel %vm586_vm15, %v2882_v24, %v2880_v23 }
 0x2af   :  { %v685_v54 = vpop.permute.xlu0 %684  ;;  %763 = vmatprep.subr.mxu1 %v347_v55 }
 0x2b0   :  { %v688_v6 = vsel %vm686_vm11, %v681_v60, %v685_v54  ;;  %v690_v62 = vsel %vm686_vm11, %v685_v54, %v681_v60  ;;  %764 = vmatpush1.msra.mxu1 %v346_v53 }
 0x2b1   :  { %v701_v0 = vmul.f32 %v694_v30, %v688_v6  ;;  %v702_v32 = vmul.f32 %v698_v31, %v690_v62  ;;  %v656_v33 = vpop.permute.xlu1 %655  ;;  %765 = vmatprep.subr.mxu1 %v345_v29  ;;  %v625_v29 = vmul.f32 %v623_v3, %v614_v15  ;;  %v594_v30 = vrot.slane %v3003_v4, %v2633_v41  ;;  %v710_v15 = vld [vmem:[%s3326_s5 + $0x38] sm:$0xff] }
 0x2b2   :  { %766 = vmatpush1.msra.mxu1 %v344_v57  ;;  %v598_v31 = vrot.slane %v3008_v27, %v2633_v41  ;;  %v624_v57 = vmul.f32 %v619_v61, %v612_v38  ;;  %v587_v41 = vsel %vm586_vm15, %v2880_v23, %v2882_v24  ;;  %v564_v23 = vsel %vm205_vm0, %v2886_v26, %v2884_v25  ;;  %v1088_v38 = vld [vmem:[#allocation2 + $0x338] sm:$0xff] }
 0x2b3   :  { %v660_v36 = vpop.permute.xlu0 %659  ;;  %767 = vmatprep.subr.mxu1 %v702_v32  ;;  %v569_v32 = vrot.slane %v3003_v4, %v2653_v56 }
 0x2b4   :  { %v663_v9 = vsel %vm661_vm12, %v656_v33, %v660_v36  ;;  %v665_v47 = vsel %vm661_vm12, %v660_v36, %v656_v33  ;;  %768 = vmatpush2.msra.mxu1 %v701_v0  ;;  %v600_v0 = vmul.f32 %v598_v31, %v589_v18  ;;  %v573_v33 = vrot.slane %v3008_v27, %v2653_v56  ;;  %v1017_v18 = vld [vmem:[#allocation2 + $0x100] sm:$0xff] }
 0x2b5   :  { %v676_v37 = vmul.f32 %v669_v21, %v663_v9  ;;  %v677_v40 = vmul.f32 %v673_v34, %v665_v47  ;;  %v631_v1 = vpop.permute.xlu1 %630  ;;  %769 = vmatprep.subr.mxu1 %v700_v20  ;;  %v599_v21 = vmul.f32 %v594_v30, %v587_v41  ;;  %v562_v56 = vsel %vm205_vm0, %v2884_v25, %v2886_v26  ;;  %v992_v41 = vld [vmem:[#allocation2 + $0x38] sm:$0xff] }
 0x2b6   :  { %770 = vmatpush2.msra.mxu1 %v699_v49  ;;  %v575_v9 = vmul.f32 %v573_v33, %v564_v23  ;;  %v545_v47 = vrot.slane %v3003_v4, %v2663_v63  ;;  %v540_v25 = vsel %vm188_vm1, %v2917_v12, %v2915_v58  ;;  %v538_v63 = vsel %vm188_vm1, %v2915_v58, %v2917_v12 }
 0x2b7   :  { %v635_v44 = vpop.permute.xlu0 %634  ;;  %771 = vmatprep.subr.mxu1 %v677_v40  ;;  %v521_v40 = vrot.slane %v3003_v4, %v2679_v16 }
 0x2b8   :  { %v638_v14 = vsel %vm636_vm13, %v631_v1, %v635_v44  ;;  %v640_v46 = vsel %vm636_vm13, %v635_v44, %v631_v1  ;;  %772 = vmatpush2.msra.mxu1 %v676_v37  ;;  %v574_v1 = vmul.f32 %v569_v32, %v562_v56  ;;  %v525_v44 = vrot.slane %v3008_v27, %v2679_v16 }
 0x2b9   :  { %v651_v48 = vmul.f32 %v644_v42, %v638_v14  ;;  %v652_v39 = vmul.f32 %v648_v43, %v640_v46  ;;  %v606_v50 = vpop.permute.xlu1 %605  ;;  %773 = vmatprep.subr.mxu1 %v675_v2  ;;  %v550_v14 = vmul.f32 %v545_v47, %v538_v63 }
 0x2ba   :  { %774 = vmatpush2.msra.mxu1 %v674_v45  ;;  %v551_v45 = vmul.f32 %v549_v22, %v540_v25 }
 0x2bb   :  { %v610_v28 = vpop.permute.xlu0 %609  ;;  %775 = vmatprep.subr.mxu1 %v652_v39 }
 0x2bc   :  { %v613_v17 = vsel %vm611_vm14, %v606_v50, %v610_v28  ;;  %v615_v52 = vsel %vm611_vm14, %v610_v28, %v606_v50  ;;  %776 = vmatpush2.msra.mxu1 %v651_v48  ;;  %v708_v28 = vld [vmem:[%s3326_s5 + $0x28] sm:$0xff] }
 0x2bd   :  { %v626_v53 = vmul.f32 %v619_v61, %v613_v17  ;;  %v627_v55 = vmul.f32 %v623_v3, %v615_v52  ;;  %v581_v60 = vpop.permute.xlu1 %580  ;;  %777 = vmatprep.subr.mxu1 %v650_v59  ;;  %v703_v61 = vld [vmem:[%s3326_s5] sm:$0xff]  ;;  %v706_v3 = vld [vmem:[%s3326_s5 + $0x18] sm:$0xff]  ;;  %v709_v17 = vld [vmem:[%s3326_s5 + $0x30] sm:$0xff] }
 0x2be   :  { %778 = vmatpush2.msra.mxu1 %v649_v51  ;;  %v707_v51 = vld [vmem:[%s3326_s5 + $0x20] sm:$0xff]  ;;  %v1082_v52 = vld [vmem:[#allocation2 + $0x308] sm:$0xff] }
 0x2bf   :  { %v585_v54 = vpop.permute.xlu0 %584  ;;  %779 = vmatprep.subr.mxu1 %v627_v55  ;;  %1144 = vmatprep.subr.mxu0 %v1082_v52  ;;  %v1087_v55 = vld [vmem:[#allocation2 + $0x330] sm:$0xff] }
 0x2c0   :  { %v588_v19 = vsel %vm586_vm15, %v581_v60, %v585_v54  ;;  %v590_v5 = vsel %vm586_vm15, %v585_v54, %v581_v60  ;;  %780 = vmatpush2.msra.mxu1 %v626_v53  ;;  %v1081_v53 = vld [vmem:[#allocation2 + $0x300] sm:$0xff]  ;;  %v1050_v60 = vld [vmem:[#allocation2 + $0x208] sm:$0xff] }
 0x2c1   :  { %v601_v6 = vmul.f32 %v594_v30, %v588_v19  ;;  %v602_v62 = vmul.f32 %v598_v31, %v590_v5  ;;  %v557_v13 = vpop.permute.xlu1 %556  ;;  %781 = vmatprep.subr.mxu1 %v625_v29  ;;  %1145 = vmatpush1.xpose.msra.mxu0 %v1081_v53  ;;  %v1056_v29 = vld [vmem:[#allocation2 + $0x238] sm:$0xff]  ;;  %v1049_v30 = vld [vmem:[#allocation2 + $0x200] sm:$0xff]  ;;  %v1055_v31 = vld [vmem:[#allocation2 + $0x230] sm:$0xff] }
 0x2c2   :  { %782 = vmatpush2.msra.mxu1 %v624_v57  ;;  %1146 = vmatprep.subr.mxu0 %v1050_v60  ;;  %v1018_v54 = vld [vmem:[#allocation2 + $0x108] sm:$0xff]  ;;  %v1024_v57 = vld [vmem:[#allocation2 + $0x138] sm:$0xff]  ;;  %v1023_v19 = vld [vmem:[#allocation2 + $0x130] sm:$0xff] }
 0x2c3   :  { %v561_v20 = vpop.permute.xlu0 %560  ;;  %783 = vmatprep.subr.mxu1 %v602_v62  ;;  %v986_v5 = vld [vmem:[#allocation2 + $0x8] sm:$0xff]  ;;  %v991_v62 = vld [vmem:[#allocation2 + $0x30] sm:$0xff]  ;;  %v1020_v60 = vld [vmem:[#allocation2 + $0x118] sm:$0xff] }
 0x2c4   :  { %v563_v24 = vsel %vm205_vm0, %v557_v13, %v561_v20  ;;  %v565_v34 = vsel %vm205_vm0, %v561_v20, %v557_v13  ;;  %784 = vmatpush2.msra.mxu1 %v601_v6  ;;  %v985_v6 = vld [vmem:[#allocation2] sm:$0xff]  ;;  %v1084_v13 = vld [vmem:[#allocation2 + $0x318] sm:$0xff]  ;;  %vm838_vm0 = vcmask 1040384  }
 0x2c5   :  { %v576_v36 = vmul.f32 %v569_v32, %v563_v24  ;;  %v577_v49 = vmul.f32 %v573_v33, %v565_v34  ;;  %v533_v8 = vpop.permute.xlu1 %532  ;;  %785 = vmatprep.subr.mxu1 %v600_v0  ;;  %1147 = vmatpush1.xpose.msra.mxu0 %v1049_v30  ;;  %v1092_v0 = vld [vmem:[#allocation2 + $0x358] sm:$0xff] }
 0x2c6   :  { %786 = vmatpush2.msra.mxu1 %v599_v21  ;;  %1148 = vmatprep.subr.mxu0 %v1018_v54 }
 0x2c7   :  { %v537_v37 = vpop.permute.xlu0 %536  ;;  %787 = vmatprep.subr.mxu1 %v577_v49 }
 0x2c8   :  { %v539_v26 = vsel %vm188_vm1, %v533_v8, %v537_v37  ;;  %v541_v2 = vsel %vm188_vm1, %v537_v37, %v533_v8  ;;  %788 = vmatpush2.msra.mxu1 %v576_v36  ;;  %vm2454_vm1 = vmmov 0  }
 0x2c9   :  { %v552_v42 = vmul.f32 %v545_v47, %v539_v26  ;;  %v553_v4 = vmul.f32 %v549_v22, %v541_v2  ;;  %v509_v43 = vpop.permute.xlu1 %508  ;;  %789 = vmatprep.subr.mxu1 %v575_v9  ;;  %1149 = vmatpush1.xpose.msra.mxu0 %v1017_v18  ;;  %v1027_v18 = vld [vmem:[#allocation2 + $0x150] sm:$0xff] }
 0x2ca   :  { %790 = vmatpush2.msra.mxu1 %v574_v1  ;;  %1150 = vmatprep.subr.mxu0 %v986_v5  ;;  %v996_v5 = vld [vmem:[#allocation2 + $0x58] sm:$0xff] }
 0x2cb   :  { %v513_v10 = vpop.permute.xlu0 %512  ;;  %791 = vmatprep.subr.mxu1 %v553_v4 }
 0x2cc   :  { %v515_v46 = vsel %vm171_vm2, %v509_v43, %v513_v10  ;;  %v517_v35 = vsel %vm171_vm2, %v513_v10, %v509_v43  ;;  %792 = vmatpush2.msra.mxu1 %v552_v42 }
 0x2cd   :  { %v528_v58 = vmul.f32 %v521_v40, %v515_v46  ;;  %v529_v12 = vmul.f32 %v525_v44, %v517_v35  ;;  %793 = vmatprep.subr.mxu1 %v551_v45  ;;  %v507_v48 = vpop.permute.xlu1 %506  ;;  %1151 = vmatpush1.xpose.msra.mxu0 %v985_v6 }
 0x2ce   :  { %794 = vmatpush2.msra.mxu1 %v550_v14  ;;  %1214 = vmatprep.subr.mxu0 %v1084_v13 }
 0x2cf   :  { %v511_v39 = vpop.permute.xlu0 %510  ;;  %795 = vmatprep.subr.mxu1 %v529_v12  ;;  %v1091_v12 = vld [vmem:[#allocation2 + $0x350] sm:$0xff] }
 0x2d0   :  { %v514_v16 = vsel %vm171_vm2, %v507_v48, %v511_v39  ;;  %v516_v27 = vsel %vm171_vm2, %v511_v39, %v507_v48  ;;  %796 = vmatpush2.msra.mxu1 %v528_v58  ;;  %v1083_v58 = vld [vmem:[#allocation2 + $0x310] sm:$0xff]  ;;  %vm2252_vm2 = vcmask 261120  }
 0x2d1   :  { %v526_v50 = vmul.f32 %v521_v40, %v514_v16  ;;  %v527_v59 = vmul.f32 %v525_v44, %v516_v27 }
 0x2d3   :  { %797 = vmatprep.subr.mxu1 %v527_v59 }
 0x2d4   :  { %798 = vmatpush2.msra.mxu1 %v526_v50 }
 0x2d5   :  { %800 = vmatmul.mubr.f32.vlgmr.msra.gmra.mxu1 %v703_v61  ;;  %1354 = vmatprep.subr.mxu1 %v1088_v38 }
 0x2d6   :  { %805 = vmatprep.mubr.f32.mxu1 %v706_v3  ;;  %1355 = vmatpush1.xpose.msra.mxu1 %v1087_v55  ;;  %v1052_v3 = vld [vmem:[#allocation2 + $0x218] sm:$0xff] }
 0x2d7   :  { %1356 = vmatprep.subr.mxu1 %v1056_v29  ;;  %v1028_v29 = vld [vmem:[#allocation2 + $0x158] sm:$0xff] }
 0x2d9   :  { %806 = vmatmul.mubr.f32.gmra.mxu1 %v705_v11  ;;  %v1060_v11 = vld [vmem:[#allocation2 + $0x258] sm:$0xff] }
 0x2da   :  { %811 = vmatprep.mubr.f32.mxu1 %v708_v28  ;;  %1357 = vmatpush1.xpose.msra.mxu1 %v1055_v31  ;;  %v728_v34 = vpop.permute.xlu1 %727 }
 0x2db   :  { %1358 = vmatprep.subr.mxu1 %v1024_v57  ;;  %v1019_v57 = vld [vmem:[#allocation2 + $0x110] sm:$0xff] }
 0x2dc   :  { %v718_v21 = vpop.permute.xlu0 %717 }
 0x2dd   :  { %812 = vmatmul.mubr.f32.gmra.mxu1 %v707_v51 }
 0x2de   :  { %817 = vmatprep.mubr.f32.mxu1 %v710_v15  ;;  %1359 = vmatpush1.xpose.msra.mxu1 %v1023_v19  ;;  %v733_v10 = vpop.permute.xlu1 %732  ;;  %v1051_v15 = vld [vmem:[#allocation2 + $0x210] sm:$0xff]  ;;  %v988_v19 = vld [vmem:[#allocation2 + $0x18] sm:$0xff] }
 0x2df   :  { %1360 = vmatprep.subr.mxu1 %v992_v41 }
 0x2e0   :  { %v723_v43 = vpop.permute.xlu0 %722 }
 0x2e1   :  { %818 = vmatmul.mubr.f32.gmra.mxu1 %v709_v17  ;;  %v1059_v17 = vld [vmem:[#allocation2 + $0x250] sm:$0xff] }
 0x2e2   :  { %1361 = vmatpush1.xpose.msra.mxu1 %v991_v62 }
 0x2e3   :  { %1494 = vmatprep.subr.mxu1 %v1092_v0 }
 0x395   :  { %v801_v32 = vpop.f32.mrf.mxu1 }
 0x396   :  { %v802_v56 = vadd.f32 %v801_v32, %v718_v21 }
 0x397   :  { %v803_v33 = vpop.f32.mrf.mxu1 }
 0x398   :  { %v804_v24 = vadd.f32 %v803_v33, %v718_v21  ;;  %v3172_v37 = vmax.f32 %v802_v56, 0.0  ;;  %v995_v21 = vld [vmem:[#allocation2 + $0x50] sm:$0xff]  ;;  %v1086_v56 = vld [vmem:[#allocation2 + $0x328] sm:$0xff] }
 0x399   :  { %v807_v20 = vpop.f32.mrf.mxu1 }
 0x39a   :  { %v3168_v9 = vmax.f32 %v804_v24, 0.0  ;;  %v859_v44 = vrot.slane %v3172_v37, 3  ;;  %v808_v59 = vadd.f32 %v807_v20, %v723_v43  ;;  %v889_v52 = vrot.slane %v3172_v37, 6  ;;  %v987_v20 = vld [vmem:[#allocation2 + $0x10] sm:$0xff] }
 0x39b   :  { %v809_v23 = vpop.f32.mrf.mxu1 }
 0x39c   :  { %v860_v42 = vrot.slane %v3168_v9, 3  ;;  %v810_v14 = vadd.f32 %v809_v23, %v723_v43  ;;  %v844_v48 = vrot.slane %v3168_v9, 1  ;;  %v880_v50 = vrot.slane %v3168_v9, 5 }
 0x39d   :  { %v813_v36 = vpop.f32.mrf.mxu1  ;;  %v3200_v30 = vmax.f32 %v808_v59, 0.0  ;;  %v1000_v59 = vld [vmem:[#allocation2 + $0x78] sm:$0xff] }
 0x39e   :  { %v814_v49 = vadd.f32 %v813_v36, %v728_v34  ;;  %v3196_v53 = vmax.f32 %v810_v14, 0.0  ;;  %v1054_v14 = vld [vmem:[#allocation2 + $0x228] sm:$0xff] }
 0x39f   :  { %v815_v8 = vpop.f32.mrf.mxu1  ;;  %v945_v62 = vrot.slane %v3200_v30, 4  ;;  %v965_v24 = vrot.slane %v3200_v30, 6 }
 0x3a0   :  { %v3170_v47 = vmax.f32 %v814_v49, 0.0  ;;  %v816_v22 = vadd.f32 %v815_v8, %v728_v34  ;;  %v946_v41 = vrot.slane %v3196_v53, 4  ;;  %v966_v32 = vrot.slane %v3196_v53, 6  ;;  %v1096_v49 = vld [vmem:[#allocation2 + $0x378] sm:$0xff] }
 0x3a1   :  { %v819_v40 = vpop.f32.mrf.mxu1 }
 0x3a2   :  { %v3174_v1 = vmax.f32 %v816_v22, 0.0  ;;  %v834_v25 = vrot.slane %v3170_v47, 7  ;;  %v863_v26 = vrot.slane %v3170_v47, 2  ;;  %v820_v61 = vadd.f32 %v819_v40, %v733_v10 }
 0x3a3   :  { %v821_v2 = vpop.f32.mrf.mxu1  ;;  %v893_v38 = vrot.slane %v3170_v47, 5  ;;  %v883_v36 = vrot.slane %v3170_v47, 4 }
 0x3a4   :  { %v835_v63 = vrot.slane %v3174_v1, 7  ;;  %v864_v4 = vrot.slane %v3174_v1, 2  ;;  %v884_v45 = vrot.slane %v3174_v1, 4  ;;  %v822_v39 = vadd.f32 %v821_v2, %v733_v10 }
 0x3a5   :  { %v839_v16 = vsel %vm838_vm0, %v3172_v37, %v834_v25  ;;  %v867_v27 = vsel %vm838_vm0, %v859_v44, %v863_v26  ;;  %v848_v28 = vsel %vm838_vm0, %v844_v48, %v3174_v1  ;;  %v3202_v31 = vmax.f32 %v820_v61, 0.0  ;;  %v1095_v44 = vld [vmem:[#allocation2 + $0x370] sm:$0xff]  ;;  %v1022_v48 = vld [vmem:[#allocation2 + $0x128] sm:$0xff]  ;;  %v989_v61 = vld [vmem:[#allocation2 + $0x20] sm:$0xff] }
 0x3a6   :  { %v840_v46 = vsel %vm838_vm0, %v3168_v9, %v835_v63  ;;  %v868_v35 = vsel %vm838_vm0, %v860_v42, %v864_v4  ;;  %v888_v51 = vsel %vm838_vm0, %v880_v50, %v884_v45  ;;  %v3198_v55 = vmax.f32 %v822_v39, 0.0  ;;  %v1085_v63 = vld [vmem:[#allocation2 + $0x320] sm:$0xff]  ;;  %v1032_v39 = vld [vmem:[#allocation2 + $0x178] sm:$0xff]  ;;  %v990_v50 = vld [vmem:[#allocation2 + $0x28] sm:$0xff] }
 0x3a7   :  { %1184 = vmatprep.mubr.f32.mxu0 %v840_v46  ;;  %1394 = vmatprep.mubr.f32.mxu1 %v868_v35  ;;  %v3205_v54 = vsel %vm838_vm0, %v889_v52, %v893_v38  ;;  %v949_v13 = vrot.slane %v3202_v31, 3  ;;  %v969_v34 = vrot.slane %v3202_v31, 5  ;;  %v854_v22 = vrot.slane %v3174_v1, 1  ;;  %v1064_v46 = vld [vmem:[#allocation2 + $0x278] sm:$0xff] }
 0x3a8   :  { %1185 = vmatmul.mubr.f32.vlgmr.msra.gmra.mxu0 %v839_v16  ;;  %1395 = vmatmul.mubr.f32.vlgmr.msra.gmra.mxu1 %v867_v27  ;;  %v950_v6 = vrot.slane %v3198_v55, 3  ;;  %v970_v33 = vrot.slane %v3198_v55, 5  ;;  %v843_v25 = vrot.slane %v3172_v37, 1  ;;  %v879_v26 = vrot.slane %v3172_v37, 5  ;;  %v1021_v16 = vld [vmem:[#allocation2 + $0x120] sm:$0xff]  ;;  %v1031_v27 = vld [vmem:[#allocation2 + $0x170] sm:$0xff] }
 0x3a9   :  { %1215 = vmatpush1.xpose.msra.mxu0 %v1083_v58  ;;  %1495 = vmatpush1.xpose.msra.mxu1 %v1091_v12  ;;  %v3217_v23 = vsel %vm838_vm0, %v945_v62, %v949_v13  ;;  %v3227_v40 = vsel %vm838_vm0, %v965_v24, %v969_v34  ;;  %v904_v2 = vrot.slane %v3174_v1, 6  ;;  %v850_v42 = vrot.slane %v3168_v9, 2  ;;  %v1053_v58 = vld [vmem:[#allocation2 + $0x220] sm:$0xff]  ;;  %v1063_v12 = vld [vmem:[#allocation2 + $0x270] sm:$0xff]  ;;  %v1068_v62 = vld [vmem:[#allocation2 + $0x298] sm:$0xff] }
 0x3aa   :  { %1254 = vmatprep.mubr.f32.mxu0 %v848_v28  ;;  %1534 = vmatprep.mubr.f32.mxu1 %v888_v51  ;;  %v3212_v0 = vsel %vm838_vm0, %v946_v41, %v950_v6  ;;  %v3223_v8 = vsel %vm838_vm0, %v966_v32, %v970_v33  ;;  %v847_v4 = vsel %vm838_vm0, %v843_v25, %v3170_v47  ;;  %v900_v45 = vrot.slane %v3168_v9, 7  ;;  %v1090_v28 = vld [vmem:[#allocation2 + $0x348] sm:$0xff]  ;;  %v1057_v32 = vld [vmem:[#allocation2 + $0x240] sm:$0xff]  ;;  %v1067_v33 = vld [vmem:[#allocation2 + $0x290] sm:$0xff] }
 0x3ab   :  { %1216 = vmatprep.subr.mxu0 %v1052_v3  ;;  %1496 = vmatprep.subr.mxu1 %v1060_v11  ;;  %v887_v43 = vsel %vm838_vm0, %v879_v26, %v883_v36  ;;  %v858_v10 = vsel %vm838_vm0, %v850_v42, %v854_v22  ;;  %v999_v3 = vld [vmem:[#allocation2 + $0x70] sm:$0xff]  ;;  %v853_v11 = vrot.slane %v3170_v47, 1  ;;  %v903_v51 = vrot.slane %v3170_v47, 6  ;;  %v1058_v41 = vld [vmem:[#allocation2 + $0x248] sm:$0xff]  ;;  %v1025_v24 = vld [vmem:[#allocation2 + $0x140] sm:$0xff] }
 0x3ac   :  { %v908_v35 = vsel %vm838_vm0, %v900_v45, %v904_v2  ;;  %v874_v52 = vrot.slane %v3174_v1, 3  ;;  %v899_v38 = vrot.slane %v3172_v37, 7  ;;  %v1035_v34 = vld [vmem:[#allocation2 + $0x190] sm:$0xff]  ;;  %v1004_v36 = vld [vmem:[#allocation2 + $0x98] sm:$0xff]  ;;  %v873_v25 = vrot.slane %v3170_v47, 3  ;;  %v1094_v26 = vld [vmem:[#allocation2 + $0x368] sm:$0xff] }
 0x3ad   :  { %1217 = vmatpush1.xpose.msra.mxu0 %v1051_v15  ;;  %1497 = vmatpush1.xpose.msra.mxu1 %v1059_v17  ;;  %v1100_v15 = vld [vmem:[#allocation2 + $0x398] sm:$0xff]  ;;  %v849_v17 = vrot.slane %v3172_v37, 2  ;;  %v1003_v22 = vld [vmem:[#allocation2 + $0x90] sm:$0xff]  ;;  %v894_v42 = vrot.slane %v3174_v1, 5  ;;  %v1062_v1 = vld [vmem:[#allocation2 + $0x268] sm:$0xff] }
 0x3ae   :  { %1218 = vmatprep.subr.mxu0 %v1020_v60  ;;  %1498 = vmatprep.subr.mxu1 %v1028_v29  ;;  %v1089_v60 = vld [vmem:[#allocation2 + $0x340] sm:$0xff]  ;;  %v1104_v2 = vld [vmem:[#allocation2 + $0x3b8] sm:$0xff]  ;;  %v1103_v47 = vld [vmem:[#allocation2 + $0x3b0] sm:$0xff] }
 0x3af   :  { %v857_v29 = vsel %vm838_vm0, %v849_v17, %v853_v11  ;;  %v1098_v11 = vld [vmem:[#allocation2 + $0x388] sm:$0xff]  ;;  %v935_v17 = vrot.slane %v3200_v30, 3 }
 0x3b1   :  { %1219 = vmatpush1.xpose.msra.mxu0 %v1019_v57  ;;  %1499 = vmatpush1.xpose.msra.mxu1 %v1027_v18  ;;  %v870_v57 = vrot.slane %v3168_v9, 4  ;;  %v1099_v18 = vld [vmem:[#allocation2 + $0x390] sm:$0xff] }
 0x3b2   :  { %1220 = vmatprep.subr.mxu0 %v988_v19  ;;  %1500 = vmatprep.subr.mxu1 %v996_v5  ;;  %v907_v19 = vsel %vm838_vm0, %v899_v38, %v903_v51  ;;  %v920_v5 = vrot.slane %v3196_v53, 1  ;;  %v1108_v51 = vld [vmem:[#allocation2 + $0x3d8] sm:$0xff]  ;;  %v960_v38 = vrot.slane %v3198_v55, 4 }
 0x3b3   :  { %v878_v6 = vsel %vm838_vm0, %v870_v57, %v874_v52  ;;  %v1097_v52 = vld [vmem:[#allocation2 + $0x380] sm:$0xff]  ;;  %v956_v57 = vrot.slane %v3196_v53, 5 }
 0x3b4   :  { %v924_v13 = vsel %vm838_vm0, %v920_v5, %v3198_v55  ;;  %v1076_v5 = vld [vmem:[#allocation2 + $0x2d8] sm:$0xff] }
 0x3b5   :  { %1221 = vmatpush1.xpose.msra.mxu0 %v987_v20  ;;  %1501 = vmatpush1.xpose.msra.mxu1 %v995_v21  ;;  %v1026_v20 = vld [vmem:[#allocation2 + $0x148] sm:$0xff]  ;;  %v1036_v21 = vld [vmem:[#allocation2 + $0x198] sm:$0xff] }
 0x3b6   :  { %1284 = vmatprep.subr.mxu0 %v1086_v56  ;;  %1634 = vmatprep.subr.mxu1 %v1096_v49  ;;  %v994_v56 = vld [vmem:[#allocation2 + $0x48] sm:$0xff]  ;;  %v993_v49 = vld [vmem:[#allocation2 + $0x40] sm:$0xff] }
 0x3b8   :  { %1255 = vmatmul.mubr.f32.vlgmr.msra.gmra.mxu0 %v847_v4  ;;  %1535 = vmatmul.mubr.f32.vlgmr.msra.gmra.mxu1 %v887_v43  ;;  %v919_v4 = vrot.slane %v3200_v30, 1  ;;  %v1093_v43 = vld [vmem:[#allocation2 + $0x360] sm:$0xff] }
 0x3b9   :  { %1285 = vmatpush1.xpose.msra.mxu0 %v1085_v63  ;;  %1324 = vmatprep.mubr.f32.mxu0 %v858_v10  ;;  %v869_v63 = vrot.slane %v3172_v37, 4  ;;  %v890_v10 = vrot.slane %v3168_v9, 6  ;;  %v936_v37 = vrot.slane %v3196_v53, 3  ;;  %v1071_v9 = vld [vmem:[#allocation2 + $0x2b0] sm:$0xff] }
 0x3ba   :  { %1635 = vmatpush1.xpose.msra.mxu1 %v1095_v44  ;;  %1674 = vmatprep.mubr.f32.mxu1 %v908_v35  ;;  %v940_v44 = vrot.slane %v3198_v55, 2  ;;  %v1072_v35 = vld [vmem:[#allocation2 + $0x2b8] sm:$0xff] }
 0x3bb   :  { %1286 = vmatprep.subr.mxu0 %v1054_v14  ;;  %1636 = vmatprep.subr.mxu1 %v1064_v46  ;;  %v877_v45 = vsel %vm838_vm0, %v869_v63, %v873_v25  ;;  %v923_v14 = vsel %vm838_vm0, %v919_v4, %v3202_v31  ;;  %v898_v46 = vsel %vm838_vm0, %v890_v10, %v894_v42  ;;  %v930_v25 = vrot.slane %v3198_v55, 1  ;;  %v1070_v10 = vld [vmem:[#allocation2 + $0x2a8] sm:$0xff] }
 0x3bc   :  { %v980_v63 = vrot.slane %v3198_v55, 6  ;;  %v926_v4 = vrot.slane %v3196_v53, 2 }
 0x3bd   :  { %1287 = vmatpush1.xpose.msra.mxu0 %v1053_v58  ;;  %v944_v58 = vsel %vm838_vm0, %v936_v37, %v940_v44  ;;  %v1069_v37 = vld [vmem:[#allocation2 + $0x2a0] sm:$0xff] }
 0x3be   :  { %1637 = vmatpush1.xpose.msra.mxu1 %v1063_v12  ;;  %1288 = vmatprep.subr.mxu0 %v1022_v48  ;;  %v1061_v12 = vld [vmem:[#allocation2 + $0x260] sm:$0xff]  ;;  %v1030_v48 = vld [vmem:[#allocation2 + $0x168] sm:$0xff] }
 0x3bf   :  { %1638 = vmatprep.subr.mxu1 %v1032_v39  ;;  %v1040_v39 = vld [vmem:[#allocation2 + $0x1b8] sm:$0xff] }
 0x3c1   :  { %1289 = vmatpush1.xpose.msra.mxu0 %v1021_v16  ;;  %v1029_v16 = vld [vmem:[#allocation2 + $0x160] sm:$0xff] }
 0x3c2   :  { %1639 = vmatpush1.xpose.msra.mxu1 %v1031_v27  ;;  %1290 = vmatprep.subr.mxu0 %v990_v50  ;;  %v1039_v27 = vld [vmem:[#allocation2 + $0x1b0] sm:$0xff]  ;;  %v998_v50 = vld [vmem:[#allocation2 + $0x68] sm:$0xff] }
 0x3c3   :  { %1640 = vmatprep.subr.mxu1 %v1000_v59  ;;  %v1008_v59 = vld [vmem:[#allocation2 + $0xb8] sm:$0xff] }
 0x3c5   :  { %1291 = vmatpush1.xpose.msra.mxu0 %v989_v61  ;;  %v997_v61 = vld [vmem:[#allocation2 + $0x60] sm:$0xff] }
 0x3c6   :  { %1641 = vmatpush1.xpose.msra.mxu1 %v999_v3  ;;  %1424 = vmatprep.subr.mxu0 %v1090_v28  ;;  %v1007_v3 = vld [vmem:[#allocation2 + $0xb0] sm:$0xff]  ;;  %v939_v28 = vrot.slane %v3202_v31, 2 }
 0x3c7   :  { %1774 = vmatprep.subr.mxu1 %v1100_v15  ;;  %v912_v15 = vrot.slane %v3198_v55, 7 }
 0x3c8   :  { %1325 = vmatmul.mubr.f32.vlgmr.msra.gmra.mxu0 %v857_v29  ;;  %v943_v29 = vsel %vm838_vm0, %v935_v17, %v939_v28  ;;  %v1074_v28 = vld [vmem:[#allocation2 + $0x2c8] sm:$0xff]  ;;  %v1041_v17 = vld [vmem:[#allocation2 + $0x1c0] sm:$0xff] }
 0x3c9   :  { %1675 = vmatmul.mubr.f32.vlgmr.msra.gmra.mxu1 %v907_v19  ;;  %1425 = vmatpush1.xpose.msra.mxu0 %v1089_v60  ;;  %v1107_v60 = vld [vmem:[#allocation2 + $0x3d0] sm:$0xff]  ;;  %v916_v19 = vsel %vm838_vm0, %v3196_v53, %v912_v15  ;;  %v1042_v15 = vld [vmem:[#allocation2 + $0x1c8] sm:$0xff] }
 0x3ca   :  { %1464 = vmatprep.mubr.f32.mxu0 %v878_v6  ;;  %1775 = vmatpush1.xpose.msra.mxu1 %v1099_v18  ;;  %v1066_v18 = vld [vmem:[#allocation2 + $0x288] sm:$0xff]  ;;  %v1065_v6 = vld [vmem:[#allocation2 + $0x280] sm:$0xff] }
 0x3cb   :  { %1814 = vmatprep.mubr.f32.mxu1 %v924_v13  ;;  %1426 = vmatprep.subr.mxu0 %v1058_v41  ;;  %v964_v41 = vsel %vm838_vm0, %v956_v57, %v960_v38  ;;  %v1044_v13 = vld [vmem:[#allocation2 + $0x1d8] sm:$0xff]  ;;  %v1110_v38 = vld [vmem:[#allocation2 + $0x3e8] sm:$0xff] }
 0x3cc   :  { %1776 = vmatprep.subr.mxu1 %v1068_v62  ;;  %v1075_v62 = vld [vmem:[#allocation2 + $0x2d0] sm:$0xff]  ;;  %v1046_v57 = vld [vmem:[#allocation2 + $0x1e8] sm:$0xff] }
 0x3cd   :  { %1427 = vmatpush1.xpose.msra.mxu0 %v1057_v32  ;;  %v1033_v32 = vld [vmem:[#allocation2 + $0x180] sm:$0xff] }
 0x3ce   :  { %1777 = vmatpush1.xpose.msra.mxu1 %v1067_v33  ;;  %1428 = vmatprep.subr.mxu0 %v1026_v20  ;;  %v1043_v33 = vld [vmem:[#allocation2 + $0x1d0] sm:$0xff]  ;;  %v1002_v20 = vld [vmem:[#allocation2 + $0x88] sm:$0xff] }
 0x3cf   :  { %1778 = vmatprep.subr.mxu1 %v1036_v21  ;;  %v1012_v21 = vld [vmem:[#allocation2 + $0xd8] sm:$0xff] }
 0x3d1   :  { %1429 = vmatpush1.xpose.msra.mxu0 %v1025_v24  ;;  %v1001_v24 = vld [vmem:[#allocation2 + $0x80] sm:$0xff] }
 0x3d2   :  { %1779 = vmatpush1.xpose.msra.mxu1 %v1035_v34  ;;  %1430 = vmatprep.subr.mxu0 %v994_v56  ;;  %v1011_v34 = vld [vmem:[#allocation2 + $0xd0] sm:$0xff]  ;;  %v911_v56 = vrot.slane %v3202_v31, 7 }
 0x3d3   :  { %1780 = vmatprep.subr.mxu1 %v1004_v36  ;;  %v1102_v36 = vld [vmem:[#allocation2 + $0x3a8] sm:$0xff] }
 0x3d4   :  { %v915_v42 = vsel %vm838_vm0, %v3200_v30, %v911_v56 }
 0x3d5   :  { %1431 = vmatpush1.xpose.msra.mxu0 %v993_v49  ;;  %v959_v49 = vrot.slane %v3202_v31, 4 }
 0x3d6   :  { %1781 = vmatpush1.xpose.msra.mxu1 %v1003_v22  ;;  %1564 = vmatprep.subr.mxu0 %v1094_v26  ;;  %v1112_v22 = vld [vmem:[#allocation2 + $0x3f8] sm:$0xff]  ;;  %v955_v26 = vrot.slane %v3200_v30, 5 }
 0x3d7   :  { %1914 = vmatprep.subr.mxu1 %v1104_v2  ;;  %v1101_v2 = vld [vmem:[#allocation2 + $0x3a0] sm:$0xff] }
 0x3d8   :  { %1465 = vmatmul.mubr.f32.vlgmr.msra.gmra.mxu0 %v877_v45  ;;  %v963_v44 = vsel %vm838_vm0, %v955_v26, %v959_v49  ;;  %v976_v45 = vrot.slane %v3196_v53, 7  ;;  %v1037_v53 = vld [vmem:[#allocation2 + $0x1a0] sm:$0xff] }
 0x3d9   :  { %1815 = vmatmul.mubr.f32.vlgmr.msra.gmra.mxu1 %v923_v14  ;;  %1565 = vmatpush1.xpose.msra.mxu0 %v1093_v43  ;;  %v1111_v43 = vld [vmem:[#allocation2 + $0x3f0] sm:$0xff]  ;;  %v1080_v14 = vld [vmem:[#allocation2 + $0x2f8] sm:$0xff] }
 0x3da   :  { %1604 = vmatprep.mubr.f32.mxu0 %v898_v46  ;;  %1915 = vmatpush1.xpose.msra.mxu1 %v1103_v47  ;;  %v934_v47 = vsel %vm838_vm0, %v926_v4, %v930_v25  ;;  %v984_v55 = vsel %vm838_vm0, %v976_v45, %v980_v63  ;;  %v1038_v46 = vld [vmem:[#allocation2 + $0x1a8] sm:$0xff] }
 0x3db   :  { %1954 = vmatprep.mubr.f32.mxu1 %v944_v58  ;;  %1566 = vmatprep.subr.mxu0 %v1062_v1  ;;  %v1079_v1 = vld [vmem:[#allocation2 + $0x2f0] sm:$0xff] }
 0x3dc   :  { %1916 = vmatprep.subr.mxu1 %v1072_v35  ;;  %v1048_v35 = vld [vmem:[#allocation2 + $0x1f8] sm:$0xff]  ;;  %v1047_v58 = vld [vmem:[#allocation2 + $0x1f0] sm:$0xff] }
 0x3dd   :  { %1567 = vmatpush1.xpose.msra.mxu0 %v1061_v12  ;;  %v1006_v12 = vld [vmem:[#allocation2 + $0xa8] sm:$0xff] }
 0x3de   :  { %1917 = vmatpush1.xpose.msra.mxu1 %v1071_v9  ;;  %1568 = vmatprep.subr.mxu0 %v1030_v48  ;;  %v1016_v9 = vld [vmem:[#allocation2 + $0xf8] sm:$0xff]  ;;  %v1005_v48 = vld [vmem:[#allocation2 + $0xa0] sm:$0xff] }
 0x3df   :  { %1918 = vmatprep.subr.mxu1 %v1040_v39  ;;  %v1015_v39 = vld [vmem:[#allocation2 + $0xf0] sm:$0xff] }
 0x3e1   :  { %1569 = vmatpush1.xpose.msra.mxu0 %v1029_v16  ;;  %v929_v16 = vrot.slane %v3202_v31, 1 }
 0x3e2   :  { %1919 = vmatpush1.xpose.msra.mxu1 %v1039_v27  ;;  %1570 = vmatprep.subr.mxu0 %v998_v50  ;;  %v1106_v27 = vld [vmem:[#allocation2 + $0x3c8] sm:$0xff]  ;;  %v979_v50 = vrot.slane %v3202_v31, 6  ;;  %v1073_v31 = vld [vmem:[#allocation2 + $0x2c0] sm:$0xff] }
 0x3e3   :  { %1920 = vmatprep.subr.mxu1 %v1008_v59  ;;  %v925_v59 = vrot.slane %v3200_v30, 2 }
 0x3e5   :  { %1571 = vmatpush1.xpose.msra.mxu0 %v997_v61  ;;  %v975_v61 = vrot.slane %v3200_v30, 7  ;;  %v1009_v30 = vld [vmem:[#allocation2 + $0xc0] sm:$0xff] }
 0x3e6   :  { %1921 = vmatpush1.xpose.msra.mxu1 %v1007_v3  ;;  %1704 = vmatprep.subr.mxu0 %v1098_v11  ;;  %v1105_v3 = vld [vmem:[#allocation2 + $0x3c0] sm:$0xff]  ;;  %v933_v11 = vsel %vm838_vm0, %v925_v59, %v929_v16 }
 0x3e7   :  { %2054 = vmatprep.subr.mxu1 %v1108_v51  ;;  %v983_v51 = vsel %vm838_vm0, %v975_v61, %v979_v50 }
 0x3e8   :  { %1605 = vmatmul.mubr.f32.vlgmr.msra.gmra.mxu0 %v3205_v54  ;;  %v1034_v54 = vld [vmem:[#allocation2 + $0x188] sm:$0xff] }
 0x3e9   :  { %1955 = vmatmul.mubr.f32.vlgmr.msra.gmra.mxu1 %v943_v29  ;;  %1705 = vmatpush1.xpose.msra.mxu0 %v1097_v52  ;;  %v1010_v52 = vld [vmem:[#allocation2 + $0xc8] sm:$0xff] }
 0x3ea   :  { %1744 = vmatprep.mubr.f32.mxu0 %v916_v19  ;;  %2055 = vmatpush1.xpose.msra.mxu1 %v1107_v60  ;;  %v1109_v60 = vld [vmem:[#allocation2 + $0x3e0] sm:$0xff]  ;;  %v1078_v29 = vld [vmem:[#allocation2 + $0x2e8] sm:$0xff] }
 0x3eb   :  { %2094 = vmatprep.mubr.f32.mxu1 %v964_v41  ;;  %1706 = vmatprep.subr.mxu0 %v1066_v18  ;;  %v1045_v18 = vld [vmem:[#allocation2 + $0x1e0] sm:$0xff]  ;;  %v1014_v19 = vld [vmem:[#allocation2 + $0xe8] sm:$0xff] }
 0x3ec   :  { %2056 = vmatprep.subr.mxu1 %v1076_v5  ;;  %v1013_v5 = vld [vmem:[#allocation2 + $0xe0] sm:$0xff] }
 0x3ed   :  { %1707 = vmatpush1.xpose.msra.mxu0 %v1065_v6 }
 0x3ee   :  { %2057 = vmatpush1.xpose.msra.mxu1 %v1075_v62  ;;  %1708 = vmatprep.subr.mxu0 %v1034_v54  ;;  %v2243_v54 = vld [vmem:[%s3331_s10 + $0x10] sm:$0xff] }
 0x3ef   :  { %2058 = vmatprep.subr.mxu1 %v1044_v13  ;;  %v2241_v13 = vld [vmem:[%s3331_s10] sm:$0xff] }
 0x3f1   :  { %1709 = vmatpush1.xpose.msra.mxu0 %v1033_v32  ;;  %v2347_v32 = vld [vmem:[%s3330_s9] ss:$0 sm:$0xff] }
 0x3f2   :  { %2059 = vmatpush1.xpose.msra.mxu1 %v1043_v33  ;;  %1710 = vmatprep.subr.mxu0 %v1002_v20 }
 0x3f3   :  { %2060 = vmatprep.subr.mxu1 %v1012_v21 }
 0x3f5   :  { %1711 = vmatpush1.xpose.msra.mxu0 %v1001_v24 }
 0x3f6   :  { %2061 = vmatpush1.xpose.msra.mxu1 %v1011_v34  ;;  %1844 = vmatprep.subr.mxu0 %v1102_v36 }
 0x3f7   :  { %2194 = vmatprep.subr.mxu1 %v1112_v22 }
 0x3f8   :  { %1745 = vmatmul.mubr.f32.vlgmr.msra.gmra.mxu0 %v915_v42 }
 0x3f9   :  { %2095 = vmatmul.mubr.f32.vlgmr.msra.gmra.mxu1 %v963_v44  ;;  %1845 = vmatpush1.xpose.msra.mxu0 %v1101_v2 }
 0x3fa   :  { %1884 = vmatprep.mubr.f32.mxu0 %v934_v47  ;;  %2195 = vmatpush1.xpose.msra.mxu1 %v1111_v43 }
 0x3fb   :  { %2234 = vmatprep.mubr.f32.mxu1 %v984_v55  ;;  %1846 = vmatprep.subr.mxu0 %v1070_v10 }
 0x3fc   :  { %2196 = vmatprep.subr.mxu1 %v1080_v14 }
 0x3fd   :  { %1847 = vmatpush1.xpose.msra.mxu0 %v1069_v37 }
 0x3fe   :  { %2197 = vmatpush1.xpose.msra.mxu1 %v1079_v1  ;;  %1848 = vmatprep.subr.mxu0 %v1038_v46 }
 0x3ff   :  { %2198 = vmatprep.subr.mxu1 %v1048_v35 }
 0x401   :  { %1849 = vmatpush1.xpose.msra.mxu0 %v1037_v53 }
 0x402   :  { %2199 = vmatpush1.xpose.msra.mxu1 %v1047_v58  ;;  %1850 = vmatprep.subr.mxu0 %v1006_v12 }
 0x403   :  { %2200 = vmatprep.subr.mxu1 %v1016_v9 }
 0x405   :  { %1851 = vmatpush1.xpose.msra.mxu0 %v1005_v48 }
 0x406   :  { %2201 = vmatpush1.xpose.msra.mxu1 %v1015_v39  ;;  %1984 = vmatprep.subr.mxu0 %v1106_v27 }
 0x408   :  { %1885 = vmatmul.mubr.f32.vlgmr.msra.gmra.mxu0 %v933_v11 }
 0x409   :  { %2235 = vmatmul.mubr.f32.vlgmr.msra.gmra.mxu1 %v983_v51  ;;  %1985 = vmatpush1.xpose.msra.mxu0 %v1105_v3 }
 0x40a   :  { %2024 = vmatprep.mubr.f32.mxu0 %v3212_v0  ;;  %1986 = vmatprep.subr.mxu0 %v1074_v28  ;;  %v1077_v0 = vld [vmem:[#allocation2 + $0x2e0] sm:$0xff] }
 0x40d   :  { %1987 = vmatpush1.xpose.msra.mxu0 %v1073_v31 }
 0x40e   :  { %1988 = vmatprep.subr.mxu0 %v1042_v15 }
 0x411   :  { %1989 = vmatpush1.xpose.msra.mxu0 %v1041_v17 }
 0x412   :  { %1990 = vmatprep.subr.mxu0 %v1010_v52  ;;  %v2348_v52 = vld [vmem:[%s3332_s11] ss:$0 sm:$0xff] }
 0x415   :  { %1991 = vmatpush1.xpose.msra.mxu0 %v1009_v30 }
 0x416   :  { %2124 = vmatprep.subr.mxu0 %v1110_v38 }
 0x418   :  { %2025 = vmatmul.mubr.f32.vlgmr.msra.gmra.mxu0 %v3217_v23 }
 0x419   :  { %2125 = vmatpush1.xpose.msra.mxu0 %v1109_v60  ;;  %2164 = vmatprep.mubr.f32.mxu0 %v3223_v8  ;;  %v2244_v8 = vld [vmem:[%s3331_s10 + $0x18] sm:$0xff] }
 0x41a   :  { %2126 = vmatprep.subr.mxu0 %v1078_v29 }
 0x41d   :  { %2127 = vmatpush1.xpose.msra.mxu0 %v1077_v0 }
 0x41e   :  { %2128 = vmatprep.subr.mxu0 %v1046_v57 }
 0x421   :  { %2129 = vmatpush1.xpose.msra.mxu0 %v1045_v18 }
 0x422   :  { %2130 = vmatprep.subr.mxu0 %v1014_v19 }
 0x425   :  { %2131 = vmatpush1.xpose.msra.mxu0 %v1013_v5 }
 0x426   :  { %2355 = vmatprep.subr.mxu0 %v2443_v7 }
 0x428   :  { %2165 = vmatmul.mubr.f32.vlgmr.msra.gmra.mxu0 %v3227_v40  ;;  %v2242_v40 = vld [vmem:[%s3331_s10 + $0x8] sm:$0xff] }
 0x429   :  { %2356 = vmatpush3.msra.mxu0 %v2244_v8  ;;  %2363 = vmatprep.mubr.msk.f32.mxu0 %vm2454_vm1, %v2443_v7 }
 0x42a   :  { %2357 = vmatprep.subr.mxu0 %v2443_v7 }
 0x42b   :  { %2358 = vmatpush3.msra.mxu0 %v2243_v54 }
 0x42c   :  { %2359 = vmatprep.subr.mxu0 %v2443_v7 }
 0x42d   :  { %2360 = vmatpush3.msra.mxu0 %v2242_v40 }
 0x42e   :  { %2361 = vmatprep.subr.mxu0 %v2443_v7 }
 0x42f   :  { %2362 = vmatpush3.msra.mxu0 %v2241_v13 }
 0x468   :  { %v1186_v41 = vpop.f32.mrf.mxu0  ;;  %v1396_v23 = vpop.f32.mrf.mxu1 }
 0x469   :  { %v1187_v33 = vadd.f32 %v2347_v32, %v1186_v41 }
 0x46a   :  { %v1188_v6 = vpop.f32.mrf.mxu0  ;;  %v1398_v62 = vpop.f32.mrf.mxu1 }
 0x478   :  { %v1256_v20 = vpop.f32.mrf.mxu0  ;;  %v1536_v21 = vpop.f32.mrf.mxu1 }
 0x479   :  { %v1257_v24 = vadd.f32 %v1256_v20, %v1187_v33 }
 0x47a   :  { %v1258_v34 = vpop.f32.mrf.mxu0  ;;  %v1538_v56 = vpop.f32.mrf.mxu1 }
 0x488   :  { %v1326_v36 = vpop.f32.mrf.mxu0 }
 0x489   :  { %v1327_v49 = vadd.f32 %v1326_v36, %v1257_v24  ;;  %v1676_v22 = vpop.f32.mrf.mxu1 }
 0x48a   :  { %v1328_v25 = vpop.f32.mrf.mxu0 }
 0x48b   :  { %v1678_v26 = vpop.f32.mrf.mxu1  ;;  %v1397_v2 = vadd.f32 %v1396_v23, %v1327_v49 }
 0x498   :  { %v1466_v63 = vpop.f32.mrf.mxu0 }
 0x499   :  { %v1467_v42 = vadd.f32 %v1466_v63, %v1397_v2  ;;  %v1816_v7 = vpop.f32.mrf.mxu1 }
 0x49a   :  { %v1468_v4 = vpop.f32.mrf.mxu0 }
 0x49b   :  { %v1818_v43 = vpop.f32.mrf.mxu1  ;;  %v1537_v44 = vadd.f32 %v1536_v21, %v1467_v42 }
 0x4a8   :  { %v1606_v45 = vpop.f32.mrf.mxu0 }
 0x4a9   :  { %v1607_v10 = vadd.f32 %v1606_v45, %v1537_v44  ;;  %v1956_v47 = vpop.f32.mrf.mxu1 }
 0x4aa   :  { %v1608_v14 = vpop.f32.mrf.mxu0 }
 0x4ab   :  { %v1958_v55 = vpop.f32.mrf.mxu1  ;;  %v1677_v37 = vadd.f32 %v1676_v22, %v1607_v10 }
 0x4b8   :  { %v1746_v1 = vpop.f32.mrf.mxu0 }
 0x4b9   :  { %v1747_v46 = vadd.f32 %v1746_v1, %v1677_v37  ;;  %v2096_v35 = vpop.f32.mrf.mxu1 }
 0x4ba   :  { %v1748_v53 = vpop.f32.mrf.mxu0 }
 0x4bb   :  { %v2098_v58 = vpop.f32.mrf.mxu1  ;;  %v1817_v12 = vadd.f32 %v1816_v7, %v1747_v46 }
 0x4c8   :  { %v1886_v9 = vpop.f32.mrf.mxu0 }
 0x4c9   :  { %v2236_v48 = vpop.f32.mrf.mxu1  ;;  %v1887_v59 = vadd.f32 %v1886_v9, %v1817_v12 }
 0x4ca   :  { %v1888_v39 = vpop.f32.mrf.mxu0 }
 0x4cb   :  { %v2238_v16 = vpop.f32.mrf.mxu1  ;;  %v1957_v61 = vadd.f32 %v1956_v47, %v1887_v59 }
 0x4d8   :  { %v2026_v27 = vpop.f32.mrf.mxu0 }
 0x4d9   :  { %v2027_v3 = vadd.f32 %v2026_v27, %v1957_v61 }
 0x4da   :  { %v2028_v50 = vpop.f32.mrf.mxu0 }
 0x4db   :  { %v2097_v11 = vadd.f32 %v2096_v35, %v2027_v3 }
 0x4e8   :  { %v2166_v28 = vpop.f32.mrf.mxu0 }
 0x4e9   :  { %v2167_v51 = vadd.f32 %v2166_v28, %v2097_v11 }
 0x4ea   :  { %v2168_v31 = vpop.f32.mrf.mxu0 }
 0x4eb   :  { %v2237_v15 = vadd.f32 %v2236_v48, %v2167_v51 }
 0x4ed   :  { %v2240_v17 = vmax.f32 %v2237_v15, 0.0 }
 0x4ef   :  { %2364 = vmatmul.mubr.msk.f32.vlgmr.msra.gmra.mxu0 %vm2252_vm2, %v2240_v17 }
 0x5af   :  { %v2322_v30 = vpop.f32.mrf.mxu0 }
 0x5b0   :  { %v2323_v38 = vadd.f32 %v2348_v52, %v2322_v30 }
 0x5b1   :  { %v2365_v60 = vpop.f32.mrf.mxu0 }
 0x5b2   :  { %2327 = vst.msk [vmem:[#allocation5] sm:$0x3] %vm2326_vm3, %v2323_v38 }
 0x5b3   :  { %2421 = shalt.err (!%p2418_p9)
}
 0x5b4   :  { %2337 = dma.vmem_to_hbm [thread:$0]  %s2335_s15, 32, %s3333_s12, [#allocation4]  }
 0x5b5   :  { %2432 = dma.done.wait [#allocation4], 32  }
 0x5b6   :  { %2433 = vsyncadd [#allocation4], 4294967264 }
 0x5b7   :  { %2341 = vsyncpa [#allocation3], 1 }
 0x5b8   :  { %2342 = vsyncpa [#allocation4], 1 }

</bundles_post_ra>
